<compile_context>
chip_gen: v7x
topology: tpu7x:2x2x1
jax: 0.10.0
libtpu: 0.0.40
codegen_flags: <defaults>
</compile_context>

<pallas_src>
import functools

import jax
import jax.numpy as jnp
from jax.experimental import pallas as pl
from jax.experimental.pallas import tpu as pltpu

INPUT_CHANNELS = 4
BN_EPS = 1e-5
CIN_ALIGN = 16   # bf16 sublane packing granule for the matmul K dimension
OUT_PAD = 128    # lane-dense output width (one unmasked 128-lane store)

SA_LAYERS = [
    dict(npoint=16, radii=(0.5, 1.0), nsamples=(8, 8),
         mlp_specs=((4, 8, 8, 16), (4, 8, 8, 16))),        # [1+3, 8, 8, 16] (use_xyz)
    dict(npoint=8, radii=(1.0, 2.0), nsamples=(8, 8),
         mlp_specs=((35, 16, 16, 32), (35, 16, 16, 32))),  # [32+3, 16, 16, 32]
]


def _round_up(x, m):
    return (x + m - 1) // m * m


def _block_diag(blocks):
    rows = sum(b.shape[0] for b in blocks)
    cols = sum(b.shape[1] for b in blocks)
    out = jnp.zeros((rows, cols), blocks[0].dtype)
    r = c = 0
    for b in blocks:
        out = out.at[r:r + b.shape[0], c:c + b.shape[1]].set(b)
        r += b.shape[0]
        c += b.shape[1]
    return out


# ----------------------------------------------------------------------------- Pallas kernel
def _sa_fused_kernel(*refs, nsample, nlayers):
    """Fused shared-MLP (1x1 conv) + folded-BN + ReLU + neighbor max-pool, all MSG groups.

    refs = (g_ref, w0, b0, w1, b1, ..., o_ref)
      g_ref : (P*S, G*Cin_pad)   bf16  channel-concat of both radius groups
      w_l   : (K_l, N_l)         bf16 (l==0) / f32  block-diagonal folded-BN conv weights
              (last layer zero-padded to N = 128 lanes)
      b_l   : (1, N_l)           f32   folded BN bias (last layer zero-padded to 128)
      o_ref : (P, 128)           f32   MSG-concatenated, max-pooled features (lane-dense)
    """
    g_ref, o_ref = refs[0], refs[-1]
    p_refs = refs[1:-1]

    x = g_ref[...]                                                 # (P*S, K0)
    for l in range(nlayers):
        w = p_refs[2 * l][...]
        b = p_refs[2 * l + 1][...]
        # 1x1 Conv2d (bias=False) for both MSG groups at once (block-diag weights),
        # + BN (eval, folded into w/b) + ReLU.  f32 accumulation / f32 intermediates.
        x = jnp.maximum(jnp.dot(x, w, preferred_element_type=jnp.float32) + b, 0.0)

    rows, cw = x.shape                                             # cw == 128 (lane-dense)
    tp = rows // nsample
    pooled = jnp.max(x.reshape(tp, nsample, cw), axis=1)           # max_pool2d over nsample
    o_ref[...] = pooled                                            # single unmasked 128-lane store


def sa_fused_mlp_maxpool(grouped, weights, biases, nsample):
    """grouped: (P*S, G*Cin_pad) bf16 -> (P, 128) f32 (MSG concat in columns [:G*Cout])."""
    rows, k0 = grouped.shape
    P = rows // nsample
    out_w = weights[-1].shape[-1]                                  # 128
    nlayers = len(weights)

    flat_params = []
    for w, b in zip(weights, biases):
        flat_params += [w, b]

    # Single tile: block shapes == full array shapes (no (8,128) divisibility needed),
    # one grid step, one output store.
    in_specs = [pl.BlockSpec((rows, k0), lambda i: (0, 0))]
    in_specs += [pl.BlockSpec(a.shape, lambda i: (0, 0)) for a in flat_params]
    out_specs = pl.BlockSpec((P, out_w), lambda i: (0, 0))

    kernel = functools.partial(_sa_fused_kernel, nsample=nsample, nlayers=nlayers)
    return pl.pallas_call(
        kernel,
        out_shape=jax.ShapeDtypeStruct((P, out_w), jnp.float32),
        grid=(1,),
        in_specs=in_specs,
        out_specs=out_specs,
        compiler_params=pltpu.CompilerParams(dimension_semantics=("arbitrary",)),
    )(grouped, *flat_params)


# ----------------------------------------------------------------------------- JAX glue (sampling / grouping)
# TODO(synk): FPS and ball-query are data-dependent, sequential/gather-heavy ops; they stay in
#             plain JAX glue (a Pallas FPS/ball-query kernel fused with the grouping gather is
#             the next step to attack end-to-end latency).
def farthest_point_sample(xyz, npoint):
    """xyz: (B, N, 3) -> (B, npoint) int32. Matches CUDA FPS (seed index 0)."""
    def one(pts):
        n = pts.shape[0]

        def body(i, state):
            idxs, dists, last = state
            d = jnp.sum((pts - pts[last]) ** 2, axis=-1)
            dists = jnp.minimum(dists, d)
            nxt = jnp.argmax(dists).astype(jnp.int32)
            return idxs.at[i].set(nxt), dists, nxt

        idxs0 = jnp.zeros((npoint,), jnp.int32)
        dists0 = jnp.full((n,), 1e10, jnp.float32)
        idxs, _, _ = jax.lax.fori_loop(1, npoint, body, (idxs0, dists0, jnp.int32(0)))
        return idxs

    return jax.vmap(one)(xyz)


def ball_query(radius, nsample, xyz, new_xyz):
    """CUDA ball_query semantics: first nsample in-radius indices; slots past the count fall
    back to the first found index (0 if none). Fully vectorized (no per-slot Python loop)."""
    d2 = jnp.sum((new_xyz[:, :, None, :] - xyz[:, None, :, :]) ** 2, axis=-1)   # (B, M, N)
    mask = d2 < radius * radius
    cnt = jnp.cumsum(mask.astype(jnp.int32), axis=-1)                           # (B, M, N)
    total = cnt[..., -1]                                                        # (B, M)
    first = jnp.argmax(mask, axis=-1).astype(jnp.int32)                         # (B, M)
    sel = mask[..., None] & (cnt[..., None] ==
                             jnp.arange(1, nsample + 1, dtype=jnp.int32))       # (B, M, N, S)
    idx = jnp.argmax(sel, axis=2).astype(jnp.int32)                             # (B, M, S)
    slot_has = jnp.arange(nsample, dtype=jnp.int32)[None, None, :] < total[..., None]
    return jnp.where(slot_has, idx, first[..., None])                           # (B, M, S)


batched_gather = jax.vmap(lambda data, idx: data[idx])


# ----------------------------------------------------------------------------- parameters
# TODO(synk): BatchNorm2d is implemented in inference (eval) mode with deterministic running
#             stats folded into the conv weight / bias; training-mode batch statistics would
#             need a global cross-tile reduction.
def make_params(key):
    """Per SA layer: block-diagonal BN-folded conv weights (both MSG groups fused) and biases.

    weights[l]: (G*Cin_l, G*Cout_l)  -- last layer zero-padded to 128 output lanes
    biases[l] : (1, G*Cout_l)        -- last layer zero-padded to 128
    """
    params = []
    for layer in SA_LAYERS:
        specs = layer['mlp_specs']
        n_groups = len(specs)
        n_layers = len(specs[0]) - 1
        weights, biases = [], []
        for l in range(n_layers):
            w_blocks, b_blocks = [], []
            for g in range(n_groups):
                cin, cout = specs[g][l], specs[g][l + 1]
                key, kw, kg, kb = jax.random.split(key, 4)
                # torch Conv2d(cin, cout, 1, bias=False) weight (cout, cin, 1, 1) stored transposed.
                w = jax.random.normal(kw, (cin, cout), jnp.float32) / (cin ** 0.5)
                gamma = 1.0 + 0.1 * jax.random.normal(kg, (cout,), jnp.float32)
                beta = 0.1 * jax.random.normal(kb, (cout,), jnp.float32)
                run_mean = jnp.zeros((cout,), jnp.float32)
                run_var = jnp.ones((cout,), jnp.float32)
                scale = gamma / jnp.sqrt(run_var + BN_EPS)
                bias = beta - run_mean * scale
                w_folded = w * scale[None, :]                 # fold BN scale into conv weight
                if l == 0:                                    # match grouped-channel pad (K -> mult of 16)
                    cin_pad = _round_up(cin, CIN_ALIGN)
                    w_folded = jnp.pad(w_folded, ((0, cin_pad - cin), (0, 0)))
                w_blocks.append(w_folded)
                b_blocks.append(bias)
            W = _block_diag(w_blocks)                         # (G*Cin_l, G*Cout_l)
            B = jnp.concatenate(b_blocks).reshape(1, -1)      # (1, G*Cout_l)
            if l == n_layers - 1:                             # lane-dense output: pad N to 128
                pad_n = OUT_PAD - W.shape[1]
                W = jnp.pad(W, ((0, 0), (0, pad_n)))
                B = jnp.pad(B, ((0, 0), (0, pad_n)))
            # first-layer weight bf16 (matches bf16 grouped input); deeper layers stay f32.
            weights.append(W.astype(jnp.bfloat16 if l == 0 else jnp.float32))
            biases.append(B.astype(jnp.float32))
        out_ch = sum(s[-1] for s in specs)                    # MSG concat width (un-padded)
        params.append(dict(weights=weights, biases=biases, out_channels=out_ch))
    return params


# ----------------------------------------------------------------------------- forward
def forward(points, batch_size, params):
    # break_up_pc
    batch_idx = points[:, 0]
    xyz = points[:, 1:4]
    features = points[:, 4:]
    n = points.shape[0] // batch_size
    xyz = xyz.reshape(batch_size, n, 3)
    features = features.reshape(batch_size, n, -1)     # channels-last (torch uses (B, C, N))
    batch_idx = batch_idx.reshape(batch_size, n)

    l_xyz, l_features = [xyz], [features]
    for k, layer in enumerate(SA_LAYERS):
        cur_xyz, cur_feat = l_xyz[k], l_features[k]
        samp_idx = farthest_point_sample(cur_xyz, layer['npoint'])   # 'd-fps'
        new_xyz = batched_gather(cur_xyz, samp_idx)                  # (B, M, 3)

        nsamples = layer['nsamples']
        assert len(set(nsamples)) == 1                               # identical S across MSG groups
        nsample = nsamples[0]

        cin = 3 + cur_feat.shape[-1]                                 # use_xyz=True
        cin_pad = _round_up(cin, CIN_ALIGN)

        # Channel-concat both radius groups (with per-group zero pad to cin_pad) in ONE
        # concatenate; reshape is free and the bf16 cast fuses into the same prep pass.
        pieces = []
        for radius in layer['radii']:
            nn_idx = ball_query(radius, nsample, cur_xyz, new_xyz)   # (B, M, S)
            g_xyz = batched_gather(cur_xyz, nn_idx) - new_xyz[:, :, None, :]
            g_feat = batched_gather(cur_feat, nn_idx)
            pieces += [g_xyz, g_feat]
            if cin_pad > cin:
                pieces.append(jnp.zeros(g_xyz.shape[:3] + (cin_pad - cin,), g_xyz.dtype))
        grouped = jnp.concatenate(pieces, axis=-1)                   # (B, M, S, G*cin_pad)
        Bsz, M, S, K0 = grouped.shape
        grouped = grouped.reshape(Bsz * M * S, K0).astype(jnp.bfloat16)

        out = sa_fused_mlp_maxpool(grouped, params[k]['weights'],
                                   params[k]['biases'], nsample)     # (B*M, 128)
        out = out[:, :params[k]['out_channels']]                     # drop lane pad -> MSG concat
        l_xyz.append(new_xyz)
        l_features.append(out.reshape(Bsz, M, -1))

    point_coords_list = []
    for i in range(1, len(l_xyz)):
        bi = batch_idx[:, :l_xyz[i].shape[1]].reshape(-1, 1)
        point_coords_list.append(jnp.concatenate([bi, l_xyz[i].reshape(-1, 3)], axis=1))

    # FP_MLPS is None -> i = 0 branch of the torch forward.
    point_features = l_features[-1].reshape(-1, l_features[-1].shape[-1])
    bi_last = batch_idx[:, :l_xyz[-1].shape[1]].reshape(-1, 1)
    point_coords = jnp.concatenate([bi_last, l_xyz[-1].reshape(-1, 3)], axis=1)
    return {
        'point_coords_list': point_coords_list,
        'point_scores_list': [None] * (len(l_xyz) - 1),  # no CONFIDENCE_MLPS configured
        'point_features': point_features,
        'point_coords': point_coords,
        'point_scores': None,
    }


# ----------------------------------------------------------------------------- main
if __name__ == "__main__":
    key = jax.random.PRNGKey(0)
    batch_size, n_per_batch = 2, 64
    kxyz, kfeat = jax.random.split(key)
    xyz_in = jax.random.normal(kxyz, (batch_size, n_per_batch, 3), jnp.float32) * 2.0
    feat_in = jax.random.normal(kfeat, (batch_size, n_per_batch, INPUT_CHANNELS - 3), jnp.float32)
    bidx = jnp.repeat(jnp.arange(batch_size, dtype=jnp.float32)[:, None], n_per_batch, axis=1)
    points = jnp.concatenate([bidx[..., None], xyz_in, feat_in], axis=-1)
    points = points.reshape(-1, 1 + INPUT_CHANNELS)   # (128, 5): [batch_idx, x, y, z, feat]

    params = make_params(jax.random.PRNGKey(42))
    fwd = jax.jit(functools.partial(forward, batch_size=batch_size, params=params))
    out = fwd(points)

    jax.block_until_ready(out['point_features'])
    jax.block_until_ready(out['point_coords'])
    assert out['point_features'].shape == (batch_size * SA_LAYERS[-1]['npoint'], 64)
    assert out['point_coords'].shape == (batch_size * SA_LAYERS[-1]['npoint'], 4)
    assert bool(jnp.all(jnp.isfinite(out['point_features'])))
    print("KERNEL_OK")
</pallas_src>

<mosaic_0001>
module attributes {stable_mosaic.version = 11 : i64} {
  func.func @_sa_fused_kernel(%arg0: i32, %arg1: memref<256x32xbf16, #tpu.memory_space<vmem>>, %arg2: memref<32x16xbf16, #tpu.memory_space<vmem>>, %arg3: memref<1x16xf32, #tpu.memory_space<vmem>>, %arg4: memref<16x16xf32, #tpu.memory_space<vmem>>, %arg5: memref<1x16xf32, #tpu.memory_space<vmem>>, %arg6: memref<16x128xf32, #tpu.memory_space<vmem>>, %arg7: memref<1x128xf32, #tpu.memory_space<vmem>>, %arg8: memref<32x128xf32, #tpu.memory_space<vmem>>) attributes {dimension_semantics = [#tpu.dimension_semantics<arbitrary>], iteration_bounds = array<i64: 1>, scalar_prefetch = 0 : i64, scratch_operands = 0 : i64, tpu.core_type = #tpu.core_type<tc>, window_params = [{pipeline_mode = #tpu.pipeline_mode<synchronous>, transform_indices = @transform_0, window_bounds = array<i64: 256, 32>}, {pipeline_mode = #tpu.pipeline_mode<synchronous>, transform_indices = @transform_1, window_bounds = array<i64: 32, 16>}, {pipeline_mode = #tpu.pipeline_mode<synchronous>, transform_indices = @transform_2, window_bounds = array<i64: 1, 16>}, {pipeline_mode = #tpu.pipeline_mode<synchronous>, transform_indices = @transform_3, window_bounds = array<i64: 16, 16>}, {pipeline_mode = #tpu.pipeline_mode<synchronous>, transform_indices = @transform_4, window_bounds = array<i64: 1, 16>}, {pipeline_mode = #tpu.pipeline_mode<synchronous>, transform_indices = @transform_5, window_bounds = array<i64: 16, 128>}, {pipeline_mode = #tpu.pipeline_mode<synchronous>, transform_indices = @transform_6, window_bounds = array<i64: 1, 128>}, {pipeline_mode = #tpu.pipeline_mode<synchronous>, transform_indices = @transform_7, window_bounds = array<i64: 32, 128>}]} {
    %c0 = arith.constant 0 : index
    %c0_0 = arith.constant 0 : index
    %0 = vector.load %arg1[%c0, %c0_0] : memref<256x32xbf16, #tpu.memory_space<vmem>>, vector<256x32xbf16>
    %c0_1 = arith.constant 0 : index
    %c0_2 = arith.constant 0 : index
    %1 = vector.load %arg2[%c0_1, %c0_2] : memref<32x16xbf16, #tpu.memory_space<vmem>>, vector<32x16xbf16>
    %c0_3 = arith.constant 0 : index
    %c0_4 = arith.constant 0 : index
    %2 = vector.load %arg3[%c0_3, %c0_4] : memref<1x16xf32, #tpu.memory_space<vmem>>, vector<1x16xf32>
    %cst = arith.constant dense<0.000000e+00> : vector<256x16xf32>
    %3 = tpu.matmul %0, %1, %cst {dimension_numbers = #tpu.dot_dimension_numbers<[1], [0], [0], [1], [0, 0, 1, 1], [], []>} : vector<256x32xbf16>, vector<32x16xbf16>, vector<256x16xf32> -> vector<256x16xf32>
    %4 = vector.broadcast %2 : vector<1x16xf32> to vector<256x16xf32>
    %5 = arith.addf %3, %4 : vector<256x16xf32>
    %cst_5 = arith.constant 0.000000e+00 : f32
    %6 = vector.broadcast %cst_5 : f32 to vector<256x16xf32>
    %7 = arith.maximumf %5, %6 : vector<256x16xf32>
    %c0_6 = arith.constant 0 : index
    %c0_7 = arith.constant 0 : index
    %8 = vector.load %arg4[%c0_6, %c0_7] : memref<16x16xf32, #tpu.memory_space<vmem>>, vector<16x16xf32>
    %c0_8 = arith.constant 0 : index
    %c0_9 = arith.constant 0 : index
    %9 = vector.load %arg5[%c0_8, %c0_9] : memref<1x16xf32, #tpu.memory_space<vmem>>, vector<1x16xf32>
    %cst_10 = arith.constant dense<0.000000e+00> : vector<256x16xf32>
    %10 = tpu.matmul %7, %8, %cst_10 {dimension_numbers = #tpu.dot_dimension_numbers<[1], [0], [0], [1], [0, 0, 1, 1], [], []>} : vector<256x16xf32>, vector<16x16xf32>, vector<256x16xf32> -> vector<256x16xf32>
    %11 = vector.broadcast %9 : vector<1x16xf32> to vector<256x16xf32>
    %12 = arith.addf %10, %11 : vector<256x16xf32>
    %cst_11 = arith.constant 0.000000e+00 : f32
    %13 = vector.broadcast %cst_11 : f32 to vector<256x16xf32>
    %14 = arith.maximumf %12, %13 : vector<256x16xf32>
    %c0_12 = arith.constant 0 : index
    %c0_13 = arith.constant 0 : index
    %15 = vector.load %arg6[%c0_12, %c0_13] : memref<16x128xf32, #tpu.memory_space<vmem>>, vector<16x128xf32>
    %c0_14 = arith.constant 0 : index
    %c0_15 = arith.constant 0 : index
    %16 = vector.load %arg7[%c0_14, %c0_15] : memref<1x128xf32, #tpu.memory_space<vmem>>, vector<1x128xf32>
    %cst_16 = arith.constant dense<0.000000e+00> : vector<256x128xf32>
    %17 = tpu.matmul %14, %15, %cst_16 {dimension_numbers = #tpu.dot_dimension_numbers<[1], [0], [0], [1], [0, 0, 1, 1], [], []>} : vector<256x16xf32>, vector<16x128xf32>, vector<256x128xf32> -> vector<256x128xf32>
    %18 = vector.broadcast %16 : vector<1x128xf32> to vector<256x128xf32>
    %19 = arith.addf %17, %18 : vector<256x128xf32>
    %cst_17 = arith.constant 0.000000e+00 : f32
    %20 = vector.broadcast %cst_17 : f32 to vector<256x128xf32>
    %21 = arith.maximumf %19, %20 : vector<256x128xf32>
    %22 = vector.shape_cast %21 : vector<256x128xf32> to vector<32x8x128xf32>
    %cst_18 = arith.constant dense<0xFF800000> : vector<32x128xf32>
    %23 = vector.multi_reduction <maximumf>, %22, %cst_18 [1] : vector<32x8x128xf32> to vector<32x128xf32>
    %c0_19 = arith.constant 0 : index
    %c0_20 = arith.constant 0 : index
    %24 = vector.load %arg8[%c0_19, %c0_20] : memref<32x128xf32, #tpu.memory_space<vmem>>, vector<32x128xf32>
    tpu.vector_store %arg8[%c0_19, %c0_20], %23 {strides = array<i32>} : memref<32x128xf32, #tpu.memory_space<vmem>>, vector<32x128xf32>,
    return
  }
  func.func @transform_0(%arg0: i32) -> (i32, i32) {
    %c0_i32 = arith.constant 0 : i32
    %c0_i32_0 = arith.constant 0 : i32
    %c0_i32_1 = arith.constant 0 : i32
    return %c0_i32, %c0_i32_0 : i32, i32
  }
  func.func @transform_1(%arg0: i32) -> (i32, i32) {
    %c0_i32 = arith.constant 0 : i32
    %c0_i32_0 = arith.constant 0 : i32
    %c0_i32_1 = arith.constant 0 : i32
    return %c0_i32, %c0_i32_0 : i32, i32
  }
  func.func @transform_2(%arg0: i32) -> (i32, i32) {
    %c0_i32 = arith.constant 0 : i32
    %c0_i32_0 = arith.constant 0 : i32
    %c0_i32_1 = arith.constant 0 : i32
    return %c0_i32, %c0_i32_0 : i32, i32
  }
  func.func @transform_3(%arg0: i32) -> (i32, i32) {
    %c0_i32 = arith.constant 0 : i32
    %c0_i32_0 = arith.constant 0 : i32
    %c0_i32_1 = arith.constant 0 : i32
    return %c0_i32, %c0_i32_0 : i32, i32
  }
  func.func @transform_4(%arg0: i32) -> (i32, i32) {
    %c0_i32 = arith.constant 0 : i32
    %c0_i32_0 = arith.constant 0 : i32
    %c0_i32_1 = arith.constant 0 : i32
    return %c0_i32, %c0_i32_0 : i32, i32
  }
  func.func @transform_5(%arg0: i32) -> (i32, i32) {
    %c0_i32 = arith.constant 0 : i32
    %c0_i32_0 = arith.constant 0 : i32
    %c0_i32_1 = arith.constant 0 : i32
    return %c0_i32, %c0_i32_0 : i32, i32
  }
  func.func @transform_6(%arg0: i32) -> (i32, i32) {
    %c0_i32 = arith.constant 0 : i32
    %c0_i32_0 = arith.constant 0 : i32
    %c0_i32_1 = arith.constant 0 : i32
    return %c0_i32, %c0_i32_0 : i32, i32
  }
  func.func @transform_7(%arg0: i32) -> (i32, i32) {
    %c0_i32 = arith.constant 0 : i32
    %c0_i32_0 = arith.constant 0 : i32
    %c0_i32_1 = arith.constant 0 : i32
    return %c0_i32, %c0_i32_0 : i32, i32
  }
}

module attributes {stable_mosaic.version = 11 : i64} {
  func.func @_sa_fused_kernel(%arg0: i32, %arg1: memref<128x96xbf16, #tpu.memory_space<vmem>>, %arg2: memref<96x32xbf16, #tpu.memory_space<vmem>>, %arg3: memref<1x32xf32, #tpu.memory_space<vmem>>, %arg4: memref<32x32xf32, #tpu.memory_space<vmem>>, %arg5: memref<1x32xf32, #tpu.memory_space<vmem>>, %arg6: memref<32x128xf32, #tpu.memory_space<vmem>>, %arg7: memref<1x128xf32, #tpu.memory_space<vmem>>, %arg8: memref<16x128xf32, #tpu.memory_space<vmem>>) attributes {dimension_semantics = [#tpu.dimension_semantics<arbitrary>], iteration_bounds = array<i64: 1>, scalar_prefetch = 0 : i64, scratch_operands = 0 : i64, tpu.core_type = #tpu.core_type<tc>, window_params = [{pipeline_mode = #tpu.pipeline_mode<synchronous>, transform_indices = @transform_0, window_bounds = array<i64: 128, 96>}, {pipeline_mode = #tpu.pipeline_mode<synchronous>, transform_indices = @transform_1, window_bounds = array<i64: 96, 32>}, {pipeline_mode = #tpu.pipeline_mode<synchronous>, transform_indices = @transform_2, window_bounds = array<i64: 1, 32>}, {pipeline_mode = #tpu.pipeline_mode<synchronous>, transform_indices = @transform_3, window_bounds = array<i64: 32, 32>}, {pipeline_mode = #tpu.pipeline_mode<synchronous>, transform_indices = @transform_4, window_bounds = array<i64: 1, 32>}, {pipeline_mode = #tpu.pipeline_mode<synchronous>, transform_indices = @transform_5, window_bounds = array<i64: 32, 128>}, {pipeline_mode = #tpu.pipeline_mode<synchronous>, transform_indices = @transform_6, window_bounds = array<i64: 1, 128>}, {pipeline_mode = #tpu.pipeline_mode<synchronous>, transform_indices = @transform_7, window_bounds = array<i64: 16, 128>}]} {
    %c0 = arith.constant 0 : index
    %c0_0 = arith.constant 0 : index
    %0 = vector.load %arg1[%c0, %c0_0] : memref<128x96xbf16, #tpu.memory_space<vmem>>, vector<128x96xbf16>
    %c0_1 = arith.constant 0 : index
    %c0_2 = arith.constant 0 : index
    %1 = vector.load %arg2[%c0_1, %c0_2] : memref<96x32xbf16, #tpu.memory_space<vmem>>, vector<96x32xbf16>
    %c0_3 = arith.constant 0 : index
    %c0_4 = arith.constant 0 : index
    %2 = vector.load %arg3[%c0_3, %c0_4] : memref<1x32xf32, #tpu.memory_space<vmem>>, vector<1x32xf32>
    %cst = arith.constant dense<0.000000e+00> : vector<128x32xf32>
    %3 = tpu.matmul %0, %1, %cst {dimension_numbers = #tpu.dot_dimension_numbers<[1], [0], [0], [1], [0, 0, 1, 1], [], []>} : vector<128x96xbf16>, vector<96x32xbf16>, vector<128x32xf32> -> vector<128x32xf32>
    %4 = vector.broadcast %2 : vector<1x32xf32> to vector<128x32xf32>
    %5 = arith.addf %3, %4 : vector<128x32xf32>
    %cst_5 = arith.constant 0.000000e+00 : f32
    %6 = vector.broadcast %cst_5 : f32 to vector<128x32xf32>
    %7 = arith.maximumf %5, %6 : vector<128x32xf32>
    %c0_6 = arith.constant 0 : index
    %c0_7 = arith.constant 0 : index
    %8 = vector.load %arg4[%c0_6, %c0_7] : memref<32x32xf32, #tpu.memory_space<vmem>>, vector<32x32xf32>
    %c0_8 = arith.constant 0 : index
    %c0_9 = arith.constant 0 : index
    %9 = vector.load %arg5[%c0_8, %c0_9] : memref<1x32xf32, #tpu.memory_space<vmem>>, vector<1x32xf32>
    %cst_10 = arith.constant dense<0.000000e+00> : vector<128x32xf32>
    %10 = tpu.matmul %7, %8, %cst_10 {dimension_numbers = #tpu.dot_dimension_numbers<[1], [0], [0], [1], [0, 0, 1, 1], [], []>} : vector<128x32xf32>, vector<32x32xf32>, vector<128x32xf32> -> vector<128x32xf32>
    %11 = vector.broadcast %9 : vector<1x32xf32> to vector<128x32xf32>
    %12 = arith.addf %10, %11 : vector<128x32xf32>
    %cst_11 = arith.constant 0.000000e+00 : f32
    %13 = vector.broadcast %cst_11 : f32 to vector<128x32xf32>
    %14 = arith.maximumf %12, %13 : vector<128x32xf32>
    %c0_12 = arith.constant 0 : index
    %c0_13 = arith.constant 0 : index
    %15 = vector.load %arg6[%c0_12, %c0_13] : memref<32x128xf32, #tpu.memory_space<vmem>>, vector<32x128xf32>
    %c0_14 = arith.constant 0 : index
    %c0_15 = arith.constant 0 : index
    %16 = vector.load %arg7[%c0_14, %c0_15] : memref<1x128xf32, #tpu.memory_space<vmem>>, vector<1x128xf32>
    %cst_16 = arith.constant dense<0.000000e+00> : vector<128x128xf32>
    %17 = tpu.matmul %14, %15, %cst_16 {dimension_numbers = #tpu.dot_dimension_numbers<[1], [0], [0], [1], [0, 0, 1, 1], [], []>} : vector<128x32xf32>, vector<32x128xf32>, vector<128x128xf32> -> vector<128x128xf32>
    %18 = vector.broadcast %16 : vector<1x128xf32> to vector<128x128xf32>
    %19 = arith.addf %17, %18 : vector<128x128xf32>
    %cst_17 = arith.constant 0.000000e+00 : f32
    %20 = vector.broadcast %cst_17 : f32 to vector<128x128xf32>
    %21 = arith.maximumf %19, %20 : vector<128x128xf32>
    %22 = vector.shape_cast %21 : vector<128x128xf32> to vector<16x8x128xf32>
    %cst_18 = arith.constant dense<0xFF800000> : vector<16x128xf32>
    %23 = vector.multi_reduction <maximumf>, %22, %cst_18 [1] : vector<16x8x128xf32> to vector<16x128xf32>
    %c0_19 = arith.constant 0 : index
    %c0_20 = arith.constant 0 : index
    %24 = vector.load %arg8[%c0_19, %c0_20] : memref<16x128xf32, #tpu.memory_space<vmem>>, vector<16x128xf32>
    tpu.vector_store %arg8[%c0_19, %c0_20], %23 {strides = array<i32>} : memref<16x128xf32, #tpu.memory_space<vmem>>, vector<16x128xf32>,
    return
  }
  func.func @transform_0(%arg0: i32) -> (i32, i32) {
    %c0_i32 = arith.constant 0 : i32
    %c0_i32_0 = arith.constant 0 : i32
    %c0_i32_1 = arith.constant 0 : i32
    return %c0_i32, %c0_i32_0 : i32, i32
  }
  func.func @transform_1(%arg0: i32) -> (i32, i32) {
    %c0_i32 = arith.constant 0 : i32
    %c0_i32_0 = arith.constant 0 : i32
    %c0_i32_1 = arith.constant 0 : i32
    return %c0_i32, %c0_i32_0 : i32, i32
  }
  func.func @transform_2(%arg0: i32) -> (i32, i32) {
    %c0_i32 = arith.constant 0 : i32
    %c0_i32_0 = arith.constant 0 : i32
    %c0_i32_1 = arith.constant 0 : i32
    return %c0_i32, %c0_i32_0 : i32, i32
  }
  func.func @transform_3(%arg0: i32) -> (i32, i32) {
    %c0_i32 = arith.constant 0 : i32
    %c0_i32_0 = arith.constant 0 : i32
    %c0_i32_1 = arith.constant 0 : i32
    return %c0_i32, %c0_i32_0 : i32, i32
  }
  func.func @transform_4(%arg0: i32) -> (i32, i32) {
    %c0_i32 = arith.constant 0 : i32
    %c0_i32_0 = arith.constant 0 : i32
    %c0_i32_1 = arith.constant 0 : i32
    return %c0_i32, %c0_i32_0 : i32, i32
  }
  func.func @transform_5(%arg0: i32) -> (i32, i32) {
    %c0_i32 = arith.constant 0 : i32
    %c0_i32_0 = arith.constant 0 : i32
    %c0_i32_1 = arith.constant 0 : i32
    return %c0_i32, %c0_i32_0 : i32, i32
  }
  func.func @transform_6(%arg0: i32) -> (i32, i32) {
    %c0_i32 = arith.constant 0 : i32
    %c0_i32_0 = arith.constant 0 : i32
    %c0_i32_1 = arith.constant 0 : i32
    return %c0_i32, %c0_i32_0 : i32, i32
  }
  func.func @transform_7(%arg0: i32) -> (i32, i32) {
    %c0_i32 = arith.constant 0 : i32
    %c0_i32_0 = arith.constant 0 : i32
    %c0_i32_1 = arith.constant 0 : i32
    return %c0_i32, %c0_i32_0 : i32, i32
  }
}

</mosaic_0001>

<bundles_post_ra>
// kernel: custom-call.24
= control target key start
LH: loop header
LB: loop body
LE: loop exit
PB: predicated region body
PF: predicated region fallthrough
CT: control target
= control target key end

     0   :  { %s6_s0 = inlined_call_operand.vmem [shape: f32[2,64], index: 0, kind: output, shape index: {}]  }

// kernel: custom-call.25
= control target key start
LH: loop header
LB: loop body
LE: loop exit
PB: predicated region body
PF: predicated region fallthrough
CT: control target
= control target key end

     0   :  { %s6_s0 = inlined_call_operand.vmem [shape: f32[2,16], index: 0, kind: output, shape index: {}]  }

// kernel: forward.2
= control target key start
LH: loop header
LB: loop body
LE: loop exit
PB: predicated region body
PF: predicated region fallthrough
CT: control target
= control target key end

     0   :  { %vm162_vm0 = vcmask 261120   ;;  %vm413_vm1 = vcmask 130048   ;;  %vm1353_vm2 = vcmask 1041409   ;;  %vm1355_vm3 = vcmask 1042434   ;;  %s2096_s1 = inlined_call_operand.vmem [shape: bf16[32,16], index: 1, kind: input, shape index: {}]   ;;  %s2097_s0 = inlined_call_operand.vmem [shape: bf16[256,32], index: 0, kind: input, shape index: {}]   ;;  %s2098_s3 = inlined_call_operand.vmem [shape: f32[16,16], index: 3, kind: input, shape index: {}]   ;;  %s2099_s5 = inlined_call_operand.vmem [shape: f32[16,128], index: 5, kind: input, shape index: {}]   ;;  %s2100_s2 = inlined_call_operand.vmem [shape: f32[1,16], index: 2, kind: input, shape index: {}]   ;;  %s2101_s4 = inlined_call_operand.vmem [shape: f32[1,16], index: 4, kind: input, shape index: {}]   ;;  %s2102_s6 = inlined_call_operand.vmem [shape: f32[1,128], index: 6, kind: input, shape index: {}]   ;;  %s2103_s7 = inlined_call_operand.vmem [shape: f32[32,128], index: 7, kind: output, shape index: {}]  }
   0x1   :  { %v1737_v0 = vld [vmem:[%s2096_s1] sm:$0xff]   ;;  %v1738_v1 = vld [vmem:[%s2096_s1 + $0x8] sm:$0xff]   ;;  %v1741_v4 = vld [vmem:[%s2097_s0 + $0x10] sm:$0xff]   ;;  %vm1357_vm4 = vcmask 1043459   ;;  %vm1359_vm5 = vcmask 1044484   ;;  %vm1361_vm6 = vcmask 1045509  }
   0x2   :  { %1587 = vmatprep.subr.bf16.mxu0 %v1737_v0  ;;  %v1739_v2 = vld [vmem:[%s2097_s0] sm:$0xff]   ;;  %v1740_v3 = vld [vmem:[%s2097_s0 + $0x8] sm:$0xff]   ;;  %v1742_v5 = vld [vmem:[%s2097_s0 + $0x18] sm:$0xff]   ;;  %vm1363_vm7 = vcmask 1046534   ;;  %vm1365_vm8 = vcmask 1047559  }
   0x3   :  { %1588 = vmatpush3.bf16.msra.mxu0 %v1737_v0  ;;  %1591 = vmatprep.mubr.msk.bf16.mxu0 %vm162_vm0, %v1739_v2  ;;  %v1743_v6 = vld [vmem:[%s2097_s0 + $0x20] sm:$0xff]   ;;  %v405_v8 = vld [vmem:[%s2098_s3 + $0x8] sm:$0xff]  ;;  %v1745_v11 = vld [vmem:[%s2097_s0 + $0x30] sm:$0xff]  }
   0x4   :  { %1589 = vmatprep.subr.bf16.mxu0 %v1738_v1  ;;  %v404_v7 = vld [vmem:[%s2098_s3] sm:$0xff]  ;;  %v1744_v10 = vld [vmem:[%s2097_s0 + $0x28] sm:$0xff]   ;;  %v1746_v12 = vld [vmem:[%s2097_s0 + $0x38] sm:$0xff]  }
   0x5   :  { %v1727_v9 = vpack.c.bf16 %v405_v8, %v404_v7  ;;  %v1747_v13 = vld [vmem:[%s2097_s0 + $0x40] sm:$0xff]   ;;  %v1748_v14 = vld [vmem:[%s2097_s0 + $0x48] sm:$0xff]   ;;  %v1749_v15 = vld [vmem:[%s2097_s0 + $0x50] sm:$0xff]  }
   0x6   :  { %v1750_v16 = vld [vmem:[%s2097_s0 + $0x58] sm:$0xff]   ;;  %v1751_v17 = vld [vmem:[%s2097_s0 + $0x60] sm:$0xff]   ;;  %v1752_v18 = vld [vmem:[%s2097_s0 + $0x68] sm:$0xff]  }
   0x7   :  { %1590 = vmatpush3.bf16.msra.mxu0 %v1738_v1  ;;  %1735 = vmatprep.subr.bf16.mxu1 %v1727_v9  ;;  %v1753_v19 = vld [vmem:[%s2097_s0 + $0x70] sm:$0xff]   ;;  %v1754_v20 = vld [vmem:[%s2097_s0 + $0x78] sm:$0xff]   ;;  %v767_v21 = vld [vmem:[%s2099_s5] sm:$0xff] }
   0x8   :  { %1728 = vmatprep.subr.bf16.mxu0 %v1727_v9  ;;  %1736 = vmatpush3.bf16.msra.mxu1 %v1727_v9  ;;  %v768_v22 = vld [vmem:[%s2099_s5 + $0x8] sm:$0xff]  ;;  %v1883_v24 = vld [vmem:[%s2100_s2] ss:$0 sm:$0xff] }
   0x9   :  { %v1877_v23 = vpack.c.bf16 %v768_v22, %v767_v21 }
   0xa   :  { %1592 = vmatmul.mubr.msk.bf16.vlgmr.msra.gmra.mrb[0].mxu0 %vm162_vm0, %v1740_v3 }
   0xb   :  { %1595 = vmatprep.mubr.msk.bf16.mxu0 %vm162_vm0, %v1741_v4  ;;  %1730 = vmatpush3.bf16.msra.mxu0 %v1727_v9 }
   0xc   :  { %1732 = vmatprep.subr.bf16.mxu1 %v1877_v23 }
  0x12   :  { %1596 = vmatmul.mubr.msk.bf16.gmra.mrb[4].mxu0 %vm162_vm0, %v1742_v5 }
  0x13   :  { %1599 = vmatprep.mubr.msk.bf16.mxu0 %vm162_vm0, %v1743_v6 }
  0x1a   :  { %1600 = vmatmul.mubr.msk.bf16.gmra.mrb[8].mxu0 %vm162_vm0, %v1744_v10 }
  0x1b   :  { %1603 = vmatprep.mubr.msk.bf16.mxu0 %vm162_vm0, %v1745_v11 }
  0x22   :  { %1604 = vmatmul.mubr.msk.bf16.gmra.mrb[12].mxu0 %vm162_vm0, %v1746_v12 }
  0x23   :  { %1607 = vmatprep.mubr.msk.bf16.mxu0 %vm162_vm0, %v1747_v13 }
  0x2a   :  { %1608 = vmatmul.mubr.msk.bf16.gmra.mrb[16].mxu0 %vm162_vm0, %v1748_v14 }
  0x2b   :  { %1611 = vmatprep.mubr.msk.bf16.mxu0 %vm162_vm0, %v1749_v15 }
  0x32   :  { %1612 = vmatmul.mubr.msk.bf16.gmra.mrb[20].mxu0 %vm162_vm0, %v1750_v16 }
  0x33   :  { %1615 = vmatprep.mubr.msk.bf16.mxu0 %vm162_vm0, %v1751_v17 }
  0x3a   :  { %1616 = vmatmul.mubr.msk.bf16.gmra.mrb[24].mxu0 %vm162_vm0, %v1752_v18 }
  0x3b   :  { %1619 = vmatprep.mubr.msk.bf16.mxu0 %vm162_vm0, %v1753_v19 }
  0x42   :  { %1620 = vmatmul.mubr.msk.bf16.gmra.mrb[28].mxu0 %vm162_vm0, %v1754_v20 }
  0xdd   :  { %v1593_v25 = vpop.f32.mrb[0].mxu0 }
  0xde   :  { %v245_v26 = vpop.f32.mrb[1].mxu0  ;;  %v254_v29 = vadd.f32 %v1593_v25, %v1883_v24 }
  0xdf   :  { %v246_v27 = vadd.f32 %v1883_v24, %v245_v26  ;;  %v1594_v28 = vpop.f32.mrb[2].mxu0 }
  0xe0   :  { %v248_v30 = vpop.f32.mrb[3].mxu0  ;;  %v257_v33 = vadd.f32 %v1594_v28, %v1883_v24  ;;  %v374_v35 = vmax.f32 %v254_v29, 0.0 }
  0xe1   :  { %v372_v31 = vmax.f32 %v246_v27, 0.0  ;;  %v249_v32 = vadd.f32 %v1883_v24, %v248_v30 }
  0xe2   :  { %v375_v38 = vmax.f32 %v257_v33, 0.0 }
  0xe3   :  { %v373_v34 = vmax.f32 %v249_v32, 0.0  ;;  %1627 = vmatprep.mubr.msk.f32.mxu0 %vm413_vm1, %v372_v31 }
  0xe5   :  { %v1597_v36 = vpop.f32.mrb[4].mxu0  ;;  %1628 = vmatmul.mubr.msk.f32.vlgmr.msra.gmra.mrb[32].mxu0 %vm413_vm1, %v373_v34 }
  0xe6   :  { %v261_v37 = vpop.f32.mrb[5].mxu0  ;;  %1630 = vmatprep.mubr.msk.f32.mxu0 %vm413_vm1, %v374_v35  ;;  %v270_v41 = vadd.f32 %v1597_v36, %v1883_v24 }
  0xe7   :  { %v262_v39 = vadd.f32 %v1883_v24, %v261_v37  ;;  %v1598_v40 = vpop.f32.mrb[6].mxu0 }
  0xe8   :  { %v264_v42 = vpop.f32.mrb[7].mxu0  ;;  %v273_v45 = vadd.f32 %v1598_v40, %v1883_v24  ;;  %v378_v47 = vmax.f32 %v270_v41, 0.0 }
  0xe9   :  { %v376_v43 = vmax.f32 %v262_v39, 0.0  ;;  %v265_v44 = vadd.f32 %v1883_v24, %v264_v42  ;;  %1631 = vmatmul.mubr.msk.f32.gmra.mrb[34].mxu0 %vm413_vm1, %v375_v38 }
  0xea   :  { %v379_v50 = vmax.f32 %v273_v45, 0.0 }
  0xeb   :  { %v377_v46 = vmax.f32 %v265_v44, 0.0  ;;  %1633 = vmatprep.mubr.msk.f32.mxu0 %vm413_vm1, %v376_v43 }
  0xed   :  { %v1601_v48 = vpop.f32.mrb[8].mxu0  ;;  %1634 = vmatmul.mubr.msk.f32.gmra.mrb[36].mxu0 %vm413_vm1, %v377_v46 }
  0xee   :  { %v277_v49 = vpop.f32.mrb[9].mxu0  ;;  %1636 = vmatprep.mubr.msk.f32.mxu0 %vm413_vm1, %v378_v47  ;;  %v286_v53 = vadd.f32 %v1601_v48, %v1883_v24 }
  0xef   :  { %v278_v51 = vadd.f32 %v1883_v24, %v277_v49  ;;  %v1602_v52 = vpop.f32.mrb[10].mxu0 }
  0xf0   :  { %v280_v54 = vpop.f32.mrb[11].mxu0  ;;  %v289_v57 = vadd.f32 %v1602_v52, %v1883_v24  ;;  %v382_v59 = vmax.f32 %v286_v53, 0.0 }
  0xf1   :  { %v380_v55 = vmax.f32 %v278_v51, 0.0  ;;  %v281_v56 = vadd.f32 %v1883_v24, %v280_v54  ;;  %1637 = vmatmul.mubr.msk.f32.gmra.mrb[38].mxu0 %vm413_vm1, %v379_v50 }
  0xf2   :  { %v383_v63 = vmax.f32 %v289_v57, 0.0 }
  0xf3   :  { %v381_v58 = vmax.f32 %v281_v56, 0.0  ;;  %1639 = vmatprep.mubr.msk.f32.mxu0 %vm413_vm1, %v380_v55 }
  0xf5   :  { %v1605_v60 = vpop.f32.mrb[12].mxu0  ;;  %1640 = vmatmul.mubr.msk.f32.gmra.mrb[40].mxu0 %vm413_vm1, %v381_v58  ;;  %v1953_v58 = vld [vmem:[%s2101_s4] ss:$0 sm:$0xff] }
  0xf6   :  { %v302_v61 = vadd.f32 %v1605_v60, %v1883_v24  ;;  %v293_v62 = vpop.f32.mrb[13].mxu0  ;;  %1642 = vmatprep.mubr.msk.f32.mxu0 %vm413_vm1, %v382_v59 }
  0xf7   :  { %v294_v0 = vadd.f32 %v1883_v24, %v293_v62  ;;  %v1606_v1 = vpop.f32.mrb[14].mxu0 }
  0xf8   :  { %v386_v2 = vmax.f32 %v302_v61, 0.0  ;;  %v305_v3 = vadd.f32 %v1606_v1, %v1883_v24  ;;  %v296_v4 = vpop.f32.mrb[15].mxu0 }
  0xf9   :  { %v384_v5 = vmax.f32 %v294_v0, 0.0  ;;  %v297_v6 = vadd.f32 %v1883_v24, %v296_v4  ;;  %1643 = vmatmul.mubr.msk.f32.gmra.mrb[42].mxu0 %vm413_vm1, %v383_v63 }
  0xfa   :  { %v387_v7 = vmax.f32 %v305_v3, 0.0  ;;  %1648 = vmatprep.mubr.msk.f32.mxu1 %vm413_vm1, %v386_v2 }
  0xfb   :  { %v385_v8 = vmax.f32 %v297_v6, 0.0  ;;  %1645 = vmatprep.mubr.msk.f32.mxu0 %vm413_vm1, %v384_v5 }
  0xfc   :  { %1649 = vmatmul.mubr.msk.f32.vlgmr.msra.gmra.mrb[0].mxu1 %vm413_vm1, %v387_v7 }
  0xfd   :  { %v1609_v9 = vpop.f32.mrb[16].mxu0  ;;  %1646 = vmatmul.mubr.msk.f32.gmra.mrb[44].mxu0 %vm413_vm1, %v385_v8  ;;  %1734 = vmatpush3.bf16.msra.mxu1 %v1877_v23 }
  0xfe   :  { %v309_v10 = vpop.f32.mrb[17].mxu0  ;;  %v318_v13 = vadd.f32 %v1609_v9, %v1883_v24 }
  0xff   :  { %v310_v11 = vadd.f32 %v1883_v24, %v309_v10  ;;  %v1610_v12 = vpop.f32.mrb[18].mxu0 }
 0x100   :  { %v312_v14 = vpop.f32.mrb[19].mxu0  ;;  %v321_v17 = vadd.f32 %v1610_v12, %v1883_v24  ;;  %v390_v19 = vmax.f32 %v318_v13, 0.0 }
 0x101   :  { %v388_v15 = vmax.f32 %v310_v11, 0.0  ;;  %v313_v16 = vadd.f32 %v1883_v24, %v312_v14 }
 0x102   :  { %v391_v22 = vmax.f32 %v321_v17, 0.0 }
 0x103   :  { %v389_v18 = vmax.f32 %v313_v16, 0.0  ;;  %1651 = vmatprep.mubr.msk.f32.mxu1 %vm413_vm1, %v388_v15 }
 0x105   :  { %v1613_v20 = vpop.f32.mrb[20].mxu0  ;;  %1652 = vmatmul.mubr.msk.f32.gmra.mrb[2].mxu1 %vm413_vm1, %v389_v18 }
 0x106   :  { %v325_v21 = vpop.f32.mrb[21].mxu0  ;;  %1654 = vmatprep.mubr.msk.f32.mxu1 %vm413_vm1, %v390_v19  ;;  %v334_v26 = vadd.f32 %v1613_v20, %v1883_v24 }
 0x107   :  { %v326_v23 = vadd.f32 %v1883_v24, %v325_v21  ;;  %v1614_v25 = vpop.f32.mrb[22].mxu0 }
 0x108   :  { %v328_v27 = vpop.f32.mrb[23].mxu0  ;;  %v337_v30 = vadd.f32 %v1614_v25, %v1883_v24  ;;  %v394_v32 = vmax.f32 %v334_v26, 0.0 }
 0x109   :  { %v392_v28 = vmax.f32 %v326_v23, 0.0  ;;  %v329_v29 = vadd.f32 %v1883_v24, %v328_v27  ;;  %1655 = vmatmul.mubr.msk.f32.gmra.mrb[4].mxu1 %vm413_vm1, %v391_v22 }
 0x10a   :  { %v395_v35 = vmax.f32 %v337_v30, 0.0 }
 0x10b   :  { %v393_v31 = vmax.f32 %v329_v29, 0.0  ;;  %1657 = vmatprep.mubr.msk.f32.mxu1 %vm413_vm1, %v392_v28 }
 0x10d   :  { %v1617_v33 = vpop.f32.mrb[24].mxu0  ;;  %1658 = vmatmul.mubr.msk.f32.gmra.mrb[6].mxu1 %vm413_vm1, %v393_v31 }
 0x10e   :  { %v341_v34 = vpop.f32.mrb[25].mxu0  ;;  %1660 = vmatprep.mubr.msk.f32.mxu1 %vm413_vm1, %v394_v32  ;;  %v350_v38 = vadd.f32 %v1617_v33, %v1883_v24 }
 0x10f   :  { %v342_v36 = vadd.f32 %v1883_v24, %v341_v34  ;;  %v1618_v37 = vpop.f32.mrb[26].mxu0 }
 0x110   :  { %v344_v39 = vpop.f32.mrb[27].mxu0  ;;  %v353_v42 = vadd.f32 %v1618_v37, %v1883_v24  ;;  %v398_v44 = vmax.f32 %v350_v38, 0.0 }
 0x111   :  { %v396_v40 = vmax.f32 %v342_v36, 0.0  ;;  %v345_v41 = vadd.f32 %v1883_v24, %v344_v39  ;;  %1661 = vmatmul.mubr.msk.f32.gmra.mrb[8].mxu1 %vm413_vm1, %v395_v35 }
 0x112   :  { %v399_v47 = vmax.f32 %v353_v42, 0.0 }
 0x113   :  { %v397_v43 = vmax.f32 %v345_v41, 0.0  ;;  %1663 = vmatprep.mubr.msk.f32.mxu1 %vm413_vm1, %v396_v40 }
 0x115   :  { %v1621_v45 = vpop.f32.mrb[28].mxu0  ;;  %1664 = vmatmul.mubr.msk.f32.gmra.mrb[10].mxu1 %vm413_vm1, %v397_v43 }
 0x116   :  { %v357_v46 = vpop.f32.mrb[29].mxu0  ;;  %1666 = vmatprep.mubr.msk.f32.mxu1 %vm413_vm1, %v398_v44  ;;  %v366_v50 = vadd.f32 %v1621_v45, %v1883_v24 }
 0x117   :  { %v358_v48 = vadd.f32 %v1883_v24, %v357_v46  ;;  %v1622_v49 = vpop.f32.mrb[30].mxu0 }
 0x118   :  { %v360_v51 = vpop.f32.mrb[31].mxu0  ;;  %v369_v54 = vadd.f32 %v1622_v49, %v1883_v24  ;;  %v402_v56 = vmax.f32 %v366_v50, 0.0 }
 0x119   :  { %v400_v52 = vmax.f32 %v358_v48, 0.0  ;;  %v361_v53 = vadd.f32 %v1883_v24, %v360_v51  ;;  %1667 = vmatmul.mubr.msk.f32.gmra.mrb[12].mxu1 %vm413_vm1, %v399_v47 }
 0x11a   :  { %v403_v57 = vmax.f32 %v369_v54, 0.0 }
 0x11b   :  { %v401_v55 = vmax.f32 %v361_v53, 0.0  ;;  %1669 = vmatprep.mubr.msk.f32.mxu1 %vm413_vm1, %v400_v52 }
 0x11d   :  { %1670 = vmatmul.mubr.msk.f32.gmra.mrb[14].mxu1 %vm413_vm1, %v401_v55 }
 0x11e   :  { %1672 = vmatprep.mubr.msk.f32.mxu1 %vm413_vm1, %v402_v56 }
 0x121   :  { %1673 = vmatmul.mubr.msk.f32.gmra.mrb[16].mxu1 %vm413_vm1, %v403_v57 }
 0x1b8   :  { %v1629_v59 = vpop.f32.mrb[32].mxu0 }
 0x1b9   :  { %v582_v60 = vadd.f32 %v1629_v59, %v1953_v58  ;;  %v576_v24 = vpop.f32.mrb[33].mxu0 }
 0x1ba   :  { %v577_v61 = vadd.f32 %v1953_v58, %v576_v24 }
 0x1bb   :  { %v736_v0 = vmax.f32 %v582_v60, 0.0 }
 0x1bc   :  { %v735_v62 = vmax.f32 %v577_v61, 0.0  ;;  %v1632_v63 = vpop.f32.mrb[34].mxu0 }
 0x1bd   :  { %v592_v1 = vadd.f32 %v1632_v63, %v1953_v58  ;;  %v586_v2 = vpop.f32.mrb[35].mxu0 }
 0x1be   :  { %v587_v3 = vadd.f32 %v1953_v58, %v586_v2  ;;  %1679 = vmatprep.mubr.msk.f32.mxu1 %vm413_vm1, %v735_v62 }
 0x1bf   :  { %1680 = vmatmul.mubr.msk.f32.vlgmr.msra.gmra.mrb[18].mxu1 %vm413_vm1, %v736_v0  ;;  %v738_v6 = vmax.f32 %v592_v1, 0.0 }
 0x1c0   :  { %v737_v4 = vmax.f32 %v587_v3, 0.0  ;;  %v1635_v5 = vpop.f32.mrb[36].mxu0 }
 0x1c1   :  { %v602_v7 = vadd.f32 %v1635_v5, %v1953_v58  ;;  %v596_v8 = vpop.f32.mrb[37].mxu0 }
 0x1c2   :  { %v597_v9 = vadd.f32 %v1953_v58, %v596_v8  ;;  %1682 = vmatprep.mubr.msk.f32.mxu1 %vm413_vm1, %v737_v4 }
 0x1c3   :  { %1683 = vmatmul.mubr.msk.f32.gmra.mrb[20].mxu1 %vm413_vm1, %v738_v6  ;;  %v740_v12 = vmax.f32 %v602_v7, 0.0 }
 0x1c4   :  { %v739_v10 = vmax.f32 %v597_v9, 0.0  ;;  %v1638_v11 = vpop.f32.mrb[38].mxu0 }
 0x1c5   :  { %v612_v13 = vadd.f32 %v1638_v11, %v1953_v58  ;;  %v606_v14 = vpop.f32.mrb[39].mxu0 }
 0x1c6   :  { %v607_v15 = vadd.f32 %v1953_v58, %v606_v14  ;;  %1685 = vmatprep.mubr.msk.f32.mxu1 %vm413_vm1, %v739_v10 }
 0x1c7   :  { %1686 = vmatmul.mubr.msk.f32.gmra.mrb[22].mxu1 %vm413_vm1, %v740_v12  ;;  %v742_v18 = vmax.f32 %v612_v13, 0.0 }
 0x1c8   :  { %v741_v16 = vmax.f32 %v607_v15, 0.0  ;;  %v1641_v17 = vpop.f32.mrb[40].mxu0 }
 0x1c9   :  { %v622_v19 = vadd.f32 %v1641_v17, %v1953_v58  ;;  %v616_v20 = vpop.f32.mrb[41].mxu0 }
 0x1ca   :  { %v617_v21 = vadd.f32 %v1953_v58, %v616_v20  ;;  %1688 = vmatprep.mubr.msk.f32.mxu1 %vm413_vm1, %v741_v16 }
 0x1cb   :  { %1689 = vmatmul.mubr.msk.f32.gmra.mrb[24].mxu1 %vm413_vm1, %v742_v18  ;;  %v744_v25 = vmax.f32 %v622_v19, 0.0 }
 0x1cc   :  { %v743_v22 = vmax.f32 %v617_v21, 0.0  ;;  %v1644_v23 = vpop.f32.mrb[42].mxu0 }
 0x1cd   :  { %v632_v26 = vadd.f32 %v1644_v23, %v1953_v58  ;;  %v626_v27 = vpop.f32.mrb[43].mxu0 }
 0x1ce   :  { %v627_v28 = vadd.f32 %v1953_v58, %v626_v27  ;;  %1691 = vmatprep.mubr.msk.f32.mxu1 %vm413_vm1, %v743_v22 }
 0x1cf   :  { %v1650_v29 = vpop.f32.mrb[0].mxu1  ;;  %1692 = vmatmul.mubr.msk.f32.gmra.mrb[26].mxu1 %vm413_vm1, %v744_v25  ;;  %v746_v33 = vmax.f32 %v632_v26, 0.0 }
 0x1d0   :  { %v745_v30 = vmax.f32 %v627_v28, 0.0  ;;  %v1647_v31 = vpop.f32.mrb[44].mxu0  ;;  %v646_v32 = vpop.f32.mrb[1].mxu1  ;;  %v652_v39 = vadd.f32 %v1650_v29, %v1953_v58  ;;  %v2022_v28 = vld [vmem:[%s2102_s6] ss:$0 sm:$0xff] }
 0x1d1   :  { %v642_v34 = vadd.f32 %v1647_v31, %v1953_v58  ;;  %v636_v35 = vpop.f32.mrb[45].mxu0  ;;  %v647_v36 = vadd.f32 %v1953_v58, %v646_v32 }
 0x1d2   :  { %v637_v37 = vadd.f32 %v1953_v58, %v636_v35  ;;  %1694 = vmatprep.mubr.msk.f32.mxu1 %vm413_vm1, %v745_v30  ;;  %v750_v43 = vmax.f32 %v652_v39, 0.0 }
 0x1d3   :  { %1695 = vmatmul.mubr.msk.f32.gmra.mrb[28].mxu1 %vm413_vm1, %v746_v33  ;;  %v748_v40 = vmax.f32 %v642_v34, 0.0  ;;  %v749_v41 = vmax.f32 %v647_v36, 0.0 }
 0x1d4   :  { %v747_v38 = vmax.f32 %v637_v37, 0.0 }
 0x1d6   :  { %1697 = vmatprep.mubr.msk.f32.mxu1 %vm413_vm1, %v747_v38 }
 0x1d7   :  { %1698 = vmatmul.mubr.msk.f32.gmra.mrb[30].mxu1 %vm413_vm1, %v748_v40 }
 0x1d8   :  { %v1653_v42 = vpop.f32.mrb[2].mxu1  ;;  %1700 = vmatprep.mubr.msk.f32.mxu1 %vm413_vm1, %v749_v41 }
 0x1d9   :  { %v662_v44 = vadd.f32 %v1653_v42, %v1953_v58  ;;  %v656_v45 = vpop.f32.mrb[3].mxu1 }
 0x1da   :  { %v657_v46 = vadd.f32 %v1953_v58, %v656_v45 }
 0x1db   :  { %1701 = vmatmul.mubr.msk.f32.gmra.mrb[32].mxu1 %vm413_vm1, %v750_v43  ;;  %v752_v49 = vmax.f32 %v662_v44, 0.0 }
 0x1dc   :  { %v751_v47 = vmax.f32 %v657_v46, 0.0  ;;  %v1656_v48 = vpop.f32.mrb[4].mxu1 }
 0x1dd   :  { %v672_v50 = vadd.f32 %v1656_v48, %v1953_v58  ;;  %v666_v51 = vpop.f32.mrb[5].mxu1 }
 0x1de   :  { %v667_v52 = vadd.f32 %v1953_v58, %v666_v51  ;;  %1703 = vmatprep.mubr.msk.f32.mxu1 %vm413_vm1, %v751_v47 }
 0x1df   :  { %1704 = vmatmul.mubr.msk.f32.gmra.mrb[34].mxu1 %vm413_vm1, %v752_v49  ;;  %v754_v55 = vmax.f32 %v672_v50, 0.0 }
 0x1e0   :  { %v753_v53 = vmax.f32 %v667_v52, 0.0  ;;  %v1659_v54 = vpop.f32.mrb[6].mxu1 }
 0x1e1   :  { %v682_v56 = vadd.f32 %v1659_v54, %v1953_v58  ;;  %v676_v57 = vpop.f32.mrb[7].mxu1 }
 0x1e2   :  { %v677_v59 = vadd.f32 %v1953_v58, %v676_v57  ;;  %1706 = vmatprep.mubr.msk.f32.mxu1 %vm413_vm1, %v753_v53 }
 0x1e3   :  { %1707 = vmatmul.mubr.msk.f32.gmra.mrb[36].mxu1 %vm413_vm1, %v754_v55  ;;  %v756_v61 = vmax.f32 %v682_v56, 0.0 }
 0x1e4   :  { %v755_v60 = vmax.f32 %v677_v59, 0.0  ;;  %v1662_v24 = vpop.f32.mrb[8].mxu1 }
 0x1e5   :  { %v692_v62 = vadd.f32 %v1662_v24, %v1953_v58  ;;  %v686_v63 = vpop.f32.mrb[9].mxu1 }
 0x1e6   :  { %v687_v0 = vadd.f32 %v1953_v58, %v686_v63  ;;  %1709 = vmatprep.mubr.msk.f32.mxu1 %vm413_vm1, %v755_v60 }
 0x1e7   :  { %1710 = vmatmul.mubr.msk.f32.gmra.mrb[38].mxu1 %vm413_vm1, %v756_v61  ;;  %v758_v3 = vmax.f32 %v692_v62, 0.0 }
 0x1e8   :  { %v757_v1 = vmax.f32 %v687_v0, 0.0  ;;  %v1665_v2 = vpop.f32.mrb[10].mxu1 }
 0x1e9   :  { %v702_v4 = vadd.f32 %v1665_v2, %v1953_v58  ;;  %v696_v5 = vpop.f32.mrb[11].mxu1 }
 0x1ea   :  { %v697_v6 = vadd.f32 %v1953_v58, %v696_v5  ;;  %1712 = vmatprep.mubr.msk.f32.mxu1 %vm413_vm1, %v757_v1 }
 0x1eb   :  { %1713 = vmatmul.mubr.msk.f32.gmra.mrb[40].mxu1 %vm413_vm1, %v758_v3  ;;  %v760_v9 = vmax.f32 %v702_v4, 0.0 }
 0x1ec   :  { %v759_v7 = vmax.f32 %v697_v6, 0.0  ;;  %v1668_v8 = vpop.f32.mrb[12].mxu1 }
 0x1ed   :  { %v712_v10 = vadd.f32 %v1668_v8, %v1953_v58  ;;  %v706_v11 = vpop.f32.mrb[13].mxu1 }
 0x1ee   :  { %v707_v12 = vadd.f32 %v1953_v58, %v706_v11  ;;  %1715 = vmatprep.mubr.msk.f32.mxu1 %vm413_vm1, %v759_v7 }
 0x1ef   :  { %1716 = vmatmul.mubr.msk.f32.gmra.mrb[42].mxu1 %vm413_vm1, %v760_v9  ;;  %v762_v15 = vmax.f32 %v712_v10, 0.0 }
 0x1f0   :  { %v761_v13 = vmax.f32 %v707_v12, 0.0  ;;  %v1671_v14 = vpop.f32.mrb[14].mxu1 }
 0x1f1   :  { %v722_v16 = vadd.f32 %v1671_v14, %v1953_v58  ;;  %v716_v17 = vpop.f32.mrb[15].mxu1 }
 0x1f2   :  { %v717_v18 = vadd.f32 %v1953_v58, %v716_v17  ;;  %1718 = vmatprep.mubr.msk.f32.mxu1 %vm413_vm1, %v761_v13 }
 0x1f3   :  { %1719 = vmatmul.mubr.msk.f32.gmra.mrb[44].mxu1 %vm413_vm1, %v762_v15  ;;  %v764_v21 = vmax.f32 %v722_v16, 0.0 }
 0x1f4   :  { %v763_v19 = vmax.f32 %v717_v18, 0.0  ;;  %v1674_v20 = vpop.f32.mrb[16].mxu1 }
 0x1f5   :  { %v732_v22 = vadd.f32 %v1674_v20, %v1953_v58  ;;  %v726_v23 = vpop.f32.mrb[17].mxu1 }
 0x1f6   :  { %v727_v25 = vadd.f32 %v1953_v58, %v726_v23  ;;  %1721 = vmatprep.mubr.msk.f32.mxu1 %vm413_vm1, %v763_v19 }
 0x1f7   :  { %1722 = vmatmul.mubr.msk.f32.gmra.mrb[46].mxu1 %vm413_vm1, %v764_v21  ;;  %v766_v27 = vmax.f32 %v732_v22, 0.0 }
 0x1f8   :  { %v765_v26 = vmax.f32 %v727_v25, 0.0 }
 0x1fa   :  { %1724 = vmatprep.mubr.msk.f32.mxu1 %vm413_vm1, %v765_v26 }
 0x1fb   :  { %1725 = vmatmul.mubr.msk.f32.gmra.mrb[48].mxu1 %vm413_vm1, %v766_v27 }
 0x292   :  { %v1681_v29 = vpop.f32.mrb[18].mxu1 }
 0x293   :  { %v944_v30 = vadd.f32 %v1681_v29, %v2022_v28  ;;  %v938_v31 = vpop.f32.mrb[19].mxu1 }
 0x294   :  { %v939_v58 = vadd.f32 %v2022_v28, %v938_v31 }
 0x295   :  { %v1098_v32 = vmax.f32 %v944_v30, 0.0 }
 0x296   :  { %v1097_v33 = vmax.f32 %v939_v58, 0.0  ;;  %v1684_v34 = vpop.f32.mrb[20].mxu1 }
 0x297   :  { %v1135_v35 = vrot.slane %v1098_v32, 4  ;;  %v954_v36 = vadd.f32 %v1684_v34, %v2022_v28  ;;  %v948_v37 = vpop.f32.mrb[21].mxu1 }
 0x298   :  { %v1129_v38 = vrot.slane %v1097_v33, 4  ;;  %v949_v39 = vadd.f32 %v2022_v28, %v948_v37 }
 0x299   :  { %v1136_v40 = vmax.f32 %v1098_v32, %v1135_v35  ;;  %v1100_v41 = vmax.f32 %v954_v36, 0.0 }
 0x29a   :  { %v1130_v42 = vmax.f32 %v1097_v33, %v1129_v38  ;;  %v1099_v43 = vmax.f32 %v949_v39, 0.0  ;;  %v1687_v44 = vpop.f32.mrb[22].mxu1 }
 0x29b   :  { %v1137_v45 = vrot.slane %v1136_v40, 2  ;;  %v1147_v46 = vrot.slane %v1100_v41, 4  ;;  %v964_v47 = vadd.f32 %v1687_v44, %v2022_v28  ;;  %v958_v48 = vpop.f32.mrb[23].mxu1 }
 0x29c   :  { %v1131_v49 = vrot.slane %v1130_v42, 2  ;;  %v1141_v50 = vrot.slane %v1099_v43, 4  ;;  %v959_v51 = vadd.f32 %v2022_v28, %v958_v48 }
 0x29d   :  { %v1138_v52 = vmax.f32 %v1136_v40, %v1137_v45  ;;  %v1148_v53 = vmax.f32 %v1100_v41, %v1147_v46  ;;  %v1102_v54 = vmax.f32 %v964_v47, 0.0 }
 0x29e   :  { %v1132_v55 = vmax.f32 %v1130_v42, %v1131_v49  ;;  %v1142_v56 = vmax.f32 %v1099_v43, %v1141_v50  ;;  %v1101_v57 = vmax.f32 %v959_v51, 0.0  ;;  %v1690_v59 = vpop.f32.mrb[24].mxu1 }
 0x29f   :  { %v1139_v60 = vrot.slane %v1138_v52, 1  ;;  %v1149_v24 = vrot.slane %v1148_v53, 2  ;;  %v1159_v61 = vrot.slane %v1102_v54, 4  ;;  %v974_v62 = vadd.f32 %v1690_v59, %v2022_v28  ;;  %v968_v63 = vpop.f32.mrb[25].mxu1 }
 0x2a0   :  { %v1133_v0 = vrot.slane %v1132_v55, 1  ;;  %v1143_v1 = vrot.slane %v1142_v56, 2  ;;  %v1153_v2 = vrot.slane %v1101_v57, 4  ;;  %v969_v3 = vadd.f32 %v2022_v28, %v968_v63 }
 0x2a1   :  { %v1140_v4 = vmax.f32 %v1138_v52, %v1139_v60  ;;  %v1150_v5 = vmax.f32 %v1148_v53, %v1149_v24  ;;  %v1160_v6 = vmax.f32 %v1102_v54, %v1159_v61  ;;  %v1104_v7 = vmax.f32 %v974_v62, 0.0 }
 0x2a2   :  { %v1134_v8 = vmax.f32 %v1132_v55, %v1133_v0  ;;  %v1144_v9 = vmax.f32 %v1142_v56, %v1143_v1  ;;  %v1154_v10 = vmax.f32 %v1101_v57, %v1153_v2  ;;  %v1103_v11 = vmax.f32 %v969_v3, 0.0  ;;  %v1693_v12 = vpop.f32.mrb[26].mxu1 }
 0x2a3   :  { %v1151_v13 = vrot.slane %v1150_v5, 1  ;;  %v1161_v14 = vrot.slane %v1160_v6, 2  ;;  %v1171_v15 = vrot.slane %v1104_v7, 4  ;;  %v984_v16 = vadd.f32 %v1693_v12, %v2022_v28  ;;  %v978_v17 = vpop.f32.mrb[27].mxu1 }
 0x2a4   :  { %v1354_v18 = vsel %vm1353_vm2, %v1140_v4, %v1134_v8  ;;  %v1145_v19 = vrot.slane %v1144_v9, 1  ;;  %v1155_v20 = vrot.slane %v1154_v10, 2  ;;  %v1165_v21 = vrot.slane %v1103_v11, 4 }
 0x2a5   :  { %v1152_v22 = vmax.f32 %v1150_v5, %v1151_v13  ;;  %v1162_v23 = vmax.f32 %v1160_v6, %v1161_v14  ;;  %v1172_v25 = vmax.f32 %v1104_v7, %v1171_v15  ;;  %v1106_v26 = vmax.f32 %v984_v16, 0.0 }
 0x2a6   :  { %v1146_v27 = vmax.f32 %v1144_v9, %v1145_v19  ;;  %v1156_v29 = vmax.f32 %v1154_v10, %v1155_v20  ;;  %v1166_v30 = vmax.f32 %v1103_v11, %v1165_v21  ;;  %v979_v31 = vadd.f32 %v2022_v28, %v978_v17  ;;  %v1696_v58 = vpop.f32.mrb[28].mxu1 }
 0x2a7   :  { %v1163_v32 = vrot.slane %v1162_v23, 1  ;;  %v1173_v33 = vrot.slane %v1172_v25, 2  ;;  %v1183_v34 = vrot.slane %v1106_v26, 4  ;;  %v994_v35 = vadd.f32 %v1696_v58, %v2022_v28  ;;  %v988_v36 = vpop.f32.mrb[29].mxu1 }
 0x2a8   :  { %v1356_v37 = vsel %vm1355_vm3, %v1146_v27, %v1354_v18  ;;  %v1157_v38 = vrot.slane %v1156_v29, 1  ;;  %v1167_v39 = vrot.slane %v1166_v30, 2  ;;  %v1105_v40 = vmax.f32 %v979_v31, 0.0 }
 0x2a9   :  { %v1164_v41 = vmax.f32 %v1162_v23, %v1163_v32  ;;  %v1358_v42 = vsel %vm1357_vm4, %v1152_v22, %v1356_v37  ;;  %v1174_v43 = vmax.f32 %v1172_v25, %v1173_v33  ;;  %v1184_v44 = vmax.f32 %v1106_v26, %v1183_v34 }
 0x2aa   :  { %v1158_v45 = vmax.f32 %v1156_v29, %v1157_v38  ;;  %v1168_v46 = vmax.f32 %v1166_v30, %v1167_v39  ;;  %v1177_v47 = vrot.slane %v1105_v40, 4  ;;  %v1108_v48 = vmax.f32 %v994_v35, 0.0  ;;  %v1699_v49 = vpop.f32.mrb[30].mxu1 }
 0x2ab   :  { %v1175_v50 = vrot.slane %v1174_v43, 1  ;;  %v1185_v51 = vrot.slane %v1184_v44, 2  ;;  %v989_v52 = vadd.f32 %v2022_v28, %v988_v36  ;;  %v1004_v53 = vadd.f32 %v1699_v49, %v2022_v28  ;;  %v998_v54 = vpop.f32.mrb[31].mxu1 }
 0x2ac   :  { %v1360_v55 = vsel %vm1359_vm5, %v1158_v45, %v1358_v42  ;;  %v1169_v56 = vrot.slane %v1168_v46, 1  ;;  %v1178_v57 = vmax.f32 %v1105_v40, %v1177_v47  ;;  %v1195_v59 = vrot.slane %v1108_v48, 4 }
 0x2ad   :  { %v1176_v60 = vmax.f32 %v1174_v43, %v1175_v50  ;;  %v1362_v24 = vsel %vm1361_vm6, %v1164_v41, %v1360_v55  ;;  %v1186_v61 = vmax.f32 %v1184_v44, %v1185_v51  ;;  %v1107_v62 = vmax.f32 %v989_v52, 0.0 }
 0x2ae   :  { %v1170_v63 = vmax.f32 %v1168_v46, %v1169_v56  ;;  %v1179_v0 = vrot.slane %v1178_v57, 2  ;;  %v1196_v1 = vmax.f32 %v1108_v48, %v1195_v59  ;;  %v1110_v2 = vmax.f32 %v1004_v53, 0.0  ;;  %v1702_v3 = vpop.f32.mrb[32].mxu1 }
 0x2af   :  { %v1187_v4 = vrot.slane %v1186_v61, 1  ;;  %v1189_v5 = vrot.slane %v1107_v62, 4  ;;  %v999_v6 = vadd.f32 %v2022_v28, %v998_v54  ;;  %v1014_v7 = vadd.f32 %v1702_v3, %v2022_v28  ;;  %v1008_v8 = vpop.f32.mrb[33].mxu1 }
 0x2b0   :  { %v1364_v9 = vsel %vm1363_vm7, %v1170_v63, %v1362_v24  ;;  %v1180_v10 = vmax.f32 %v1178_v57, %v1179_v0  ;;  %v1197_v11 = vrot.slane %v1196_v1, 2  ;;  %v1207_v12 = vrot.slane %v1110_v2, 4 }
 0x2b1   :  { %v1366_v13 = vsel %vm1365_vm8, %v1176_v60, %v1364_v9  ;;  %v1188_v14 = vmax.f32 %v1186_v61, %v1187_v4  ;;  %v1190_v15 = vmax.f32 %v1107_v62, %v1189_v5  ;;  %v1109_v16 = vmax.f32 %v999_v6, 0.0 }
 0x2b2   :  { %1392 = vst [vmem:[%s2103_s7] sm:$0xff] %v1366_v13  ;;  %v1181_v17 = vrot.slane %v1180_v10, 1  ;;  %v1198_v18 = vmax.f32 %v1196_v1, %v1197_v11  ;;  %v1208_v19 = vmax.f32 %v1110_v2, %v1207_v12  ;;  %v1112_v20 = vmax.f32 %v1014_v7, 0.0  ;;  %v1705_v21 = vpop.f32.mrb[34].mxu1 }
 0x2b3   :  { %v1191_v22 = vrot.slane %v1190_v15, 2  ;;  %v1201_v23 = vrot.slane %v1109_v16, 4  ;;  %v1009_v25 = vadd.f32 %v2022_v28, %v1008_v8  ;;  %v1024_v26 = vadd.f32 %v1705_v21, %v2022_v28  ;;  %v1018_v27 = vpop.f32.mrb[35].mxu1 }
 0x2b4   :  { %v1182_v29 = vmax.f32 %v1180_v10, %v1181_v17  ;;  %v1199_v30 = vrot.slane %v1198_v18, 1  ;;  %v1209_v31 = vrot.slane %v1208_v19, 2  ;;  %v1219_v58 = vrot.slane %v1112_v20, 4 }
 0x2b5   :  { %v1192_v32 = vmax.f32 %v1190_v15, %v1191_v22  ;;  %v1202_v33 = vmax.f32 %v1109_v16, %v1201_v23  ;;  %v1111_v34 = vmax.f32 %v1009_v25, 0.0  ;;  %v1114_v35 = vmax.f32 %v1024_v26, 0.0 }
 0x2b6   :  { %v1367_v36 = vsel %vm1353_vm2, %v1188_v14, %v1182_v29  ;;  %v1200_v37 = vmax.f32 %v1198_v18, %v1199_v30  ;;  %v1210_v38 = vmax.f32 %v1208_v19, %v1209_v31  ;;  %v1220_v39 = vmax.f32 %v1112_v20, %v1219_v58  ;;  %v1708_v40 = vpop.f32.mrb[36].mxu1 }
 0x2b7   :  { %v1193_v41 = vrot.slane %v1192_v32, 1  ;;  %v1203_v42 = vrot.slane %v1202_v33, 2  ;;  %v1213_v43 = vrot.slane %v1111_v34, 4  ;;  %v1231_v44 = vrot.slane %v1114_v35, 4  ;;  %v1028_v45 = vpop.f32.mrb[37].mxu1 }
 0x2b8   :  { %v1211_v46 = vrot.slane %v1210_v38, 1  ;;  %v1221_v47 = vrot.slane %v1220_v39, 2  ;;  %v1019_v48 = vadd.f32 %v2022_v28, %v1018_v27  ;;  %v1034_v49 = vadd.f32 %v1708_v40, %v2022_v28 }
 0x2b9   :  { %v1194_v50 = vmax.f32 %v1192_v32, %v1193_v41  ;;  %v1204_v51 = vmax.f32 %v1202_v33, %v1203_v42  ;;  %v1214_v52 = vmax.f32 %v1111_v34, %v1213_v43  ;;  %v1232_v53 = vmax.f32 %v1114_v35, %v1231_v44 }
 0x2ba   :  { %v1212_v54 = vmax.f32 %v1210_v38, %v1211_v46  ;;  %v1222_v55 = vmax.f32 %v1220_v39, %v1221_v47  ;;  %v1113_v56 = vmax.f32 %v1019_v48, 0.0  ;;  %v1116_v57 = vmax.f32 %v1034_v49, 0.0  ;;  %v1711_v59 = vpop.f32.mrb[38].mxu1 }
 0x2bb   :  { %v1368_v60 = vsel %vm1355_vm3, %v1194_v50, %v1367_v36  ;;  %v1205_v24 = vrot.slane %v1204_v51, 1  ;;  %v1215_v61 = vrot.slane %v1214_v52, 2  ;;  %v1233_v62 = vrot.slane %v1232_v53, 2  ;;  %v1038_v63 = vpop.f32.mrb[39].mxu1 }
 0x2bc   :  { %v1369_v0 = vsel %vm1357_vm4, %v1200_v37, %v1368_v60  ;;  %v1223_v1 = vrot.slane %v1222_v55, 1  ;;  %v1225_v2 = vrot.slane %v1113_v56, 4  ;;  %v1243_v3 = vrot.slane %v1116_v57, 4 }
 0x2bd   :  { %v1206_v4 = vmax.f32 %v1204_v51, %v1205_v24  ;;  %v1216_v5 = vmax.f32 %v1214_v52, %v1215_v61  ;;  %v1234_v6 = vmax.f32 %v1232_v53, %v1233_v62  ;;  %v1029_v7 = vadd.f32 %v2022_v28, %v1028_v45 }
 0x2be   :  { %v1224_v8 = vmax.f32 %v1222_v55, %v1223_v1  ;;  %v1226_v9 = vmax.f32 %v1113_v56, %v1225_v2  ;;  %v1244_v10 = vmax.f32 %v1116_v57, %v1243_v3  ;;  %v1044_v11 = vadd.f32 %v1711_v59, %v2022_v28  ;;  %v1714_v12 = vpop.f32.mrb[40].mxu1 }
 0x2bf   :  { %v1370_v13 = vsel %vm1359_vm5, %v1206_v4, %v1369_v0  ;;  %v1217_v14 = vrot.slane %v1216_v5, 1  ;;  %v1235_v15 = vrot.slane %v1234_v6, 1  ;;  %v1115_v16 = vmax.f32 %v1029_v7, 0.0  ;;  %v1048_v17 = vpop.f32.mrb[41].mxu1 }
 0x2c0   :  { %v1371_v18 = vsel %vm1361_vm6, %v1212_v54, %v1370_v13  ;;  %v1227_v19 = vrot.slane %v1226_v9, 2  ;;  %v1245_v20 = vrot.slane %v1244_v10, 2  ;;  %v1118_v21 = vmax.f32 %v1044_v11, 0.0 }
 0x2c1   :  { %v1218_v22 = vmax.f32 %v1216_v5, %v1217_v14  ;;  %v1236_v23 = vmax.f32 %v1234_v6, %v1235_v15  ;;  %v1237_v25 = vrot.slane %v1115_v16, 4  ;;  %v1039_v26 = vadd.f32 %v2022_v28, %v1038_v63 }
 0x2c2   :  { %v1228_v27 = vmax.f32 %v1226_v9, %v1227_v19  ;;  %v1246_v29 = vmax.f32 %v1244_v10, %v1245_v20  ;;  %v1255_v30 = vrot.slane %v1118_v21, 4  ;;  %v1054_v31 = vadd.f32 %v1714_v12, %v2022_v28  ;;  %v1717_v58 = vpop.f32.mrb[42].mxu1 }
 0x2c3   :  { %v1372_v32 = vsel %vm1363_vm7, %v1218_v22, %v1371_v18  ;;  %v1238_v33 = vmax.f32 %v1115_v16, %v1237_v25  ;;  %v1117_v34 = vmax.f32 %v1039_v26, 0.0  ;;  %v1049_v35 = vadd.f32 %v2022_v28, %v1048_v17  ;;  %v1058_v36 = vpop.f32.mrb[43].mxu1 }
 0x2c4   :  { %v1373_v37 = vsel %vm1365_vm8, %v1224_v8, %v1372_v32  ;;  %v1229_v38 = vrot.slane %v1228_v27, 1  ;;  %v1247_v39 = vrot.slane %v1246_v29, 1  ;;  %v1256_v40 = vmax.f32 %v1118_v21, %v1255_v30 }
 0x2c5   :  { %1393 = vst [vmem:[%s2103_s7 + $0x8] sm:$0xff] %v1373_v37  ;;  %v1239_v41 = vrot.slane %v1238_v33, 2  ;;  %v1249_v42 = vrot.slane %v1117_v34, 4  ;;  %v1120_v43 = vmax.f32 %v1054_v31, 0.0  ;;  %v1119_v44 = vmax.f32 %v1049_v35, 0.0 }
 0x2c6   :  { %v1230_v45 = vmax.f32 %v1228_v27, %v1229_v38  ;;  %v1248_v46 = vmax.f32 %v1246_v29, %v1247_v39  ;;  %v1257_v47 = vrot.slane %v1256_v40, 2  ;;  %v1064_v48 = vadd.f32 %v1717_v58, %v2022_v28  ;;  %v1720_v49 = vpop.f32.mrb[44].mxu1 }
 0x2c7   :  { %v1240_v50 = vmax.f32 %v1238_v33, %v1239_v41  ;;  %v1250_v51 = vmax.f32 %v1117_v34, %v1249_v42  ;;  %v1267_v52 = vrot.slane %v1120_v43, 4  ;;  %v1261_v53 = vrot.slane %v1119_v44, 4  ;;  %v1068_v54 = vpop.f32.mrb[45].mxu1 }
 0x2c8   :  { %v1374_v55 = vsel %vm1353_vm2, %v1236_v23, %v1230_v45  ;;  %v1258_v56 = vmax.f32 %v1256_v40, %v1257_v47  ;;  %v1122_v57 = vmax.f32 %v1064_v48, 0.0  ;;  %v1059_v59 = vadd.f32 %v2022_v28, %v1058_v36 }
 0x2c9   :  { %v1241_v60 = vrot.slane %v1240_v50, 1  ;;  %v1251_v24 = vrot.slane %v1250_v51, 2  ;;  %v1268_v61 = vmax.f32 %v1120_v43, %v1267_v52  ;;  %v1262_v62 = vmax.f32 %v1119_v44, %v1261_v53 }
 0x2ca   :  { %v1259_v63 = vrot.slane %v1258_v56, 1  ;;  %v1279_v0 = vrot.slane %v1122_v57, 4  ;;  %v1121_v1 = vmax.f32 %v1059_v59, 0.0  ;;  %v1074_v2 = vadd.f32 %v1720_v49, %v2022_v28  ;;  %v1723_v3 = vpop.f32.mrb[46].mxu1 }
 0x2cb   :  { %v1242_v4 = vmax.f32 %v1240_v50, %v1241_v60  ;;  %v1252_v5 = vmax.f32 %v1250_v51, %v1251_v24  ;;  %v1269_v6 = vrot.slane %v1268_v61, 2  ;;  %v1263_v7 = vrot.slane %v1262_v62, 2  ;;  %v1078_v8 = vpop.f32.mrb[47].mxu1 }
 0x2cc   :  { %v1260_v9 = vmax.f32 %v1258_v56, %v1259_v63  ;;  %v1280_v10 = vmax.f32 %v1122_v57, %v1279_v0  ;;  %v1273_v11 = vrot.slane %v1121_v1, 4  ;;  %v1124_v12 = vmax.f32 %v1074_v2, 0.0 }
 0x2cd   :  { %v1375_v13 = vsel %vm1355_vm3, %v1242_v4, %v1374_v55  ;;  %v1253_v14 = vrot.slane %v1252_v5, 1  ;;  %v1270_v15 = vmax.f32 %v1268_v61, %v1269_v6  ;;  %v1264_v16 = vmax.f32 %v1262_v62, %v1263_v7 }
 0x2ce   :  { %v1376_v17 = vsel %vm1357_vm4, %v1248_v46, %v1375_v13  ;;  %v1281_v18 = vrot.slane %v1280_v10, 2  ;;  %v1274_v19 = vmax.f32 %v1121_v1, %v1273_v11  ;;  %v1291_v20 = vrot.slane %v1124_v12, 4  ;;  %v1726_v21 = vpop.f32.mrb[48].mxu1 }
 0x2cf   :  { %v1254_v22 = vmax.f32 %v1252_v5, %v1253_v14  ;;  %v1271_v23 = vrot.slane %v1270_v15, 1  ;;  %v1265_v25 = vrot.slane %v1264_v16, 1  ;;  %v1069_v26 = vadd.f32 %v2022_v28, %v1068_v54  ;;  %v1088_v27 = vpop.f32.mrb[49].mxu1 }
 0x2d0   :  { %v1282_v29 = vmax.f32 %v1280_v10, %v1281_v18  ;;  %v1275_v30 = vrot.slane %v1274_v19, 2  ;;  %v1292_v31 = vmax.f32 %v1124_v12, %v1291_v20  ;;  %v1084_v58 = vadd.f32 %v1723_v3, %v2022_v28 }
 0x2d1   :  { %v1377_v32 = vsel %vm1359_vm5, %v1254_v22, %v1376_v17  ;;  %v1272_v33 = vmax.f32 %v1270_v15, %v1271_v23  ;;  %v1266_v34 = vmax.f32 %v1264_v16, %v1265_v25  ;;  %v1123_v35 = vmax.f32 %v1069_v26, 0.0 }
 0x2d2   :  { %v1378_v36 = vsel %vm1361_vm6, %v1260_v9, %v1377_v32  ;;  %v1283_v37 = vrot.slane %v1282_v29, 1  ;;  %v1276_v38 = vmax.f32 %v1274_v19, %v1275_v30  ;;  %v1293_v39 = vrot.slane %v1292_v31, 2 }
 0x2d3   :  { %v1379_v40 = vsel %vm1363_vm7, %v1266_v34, %v1378_v36  ;;  %v1285_v41 = vrot.slane %v1123_v35, 4  ;;  %v1126_v42 = vmax.f32 %v1084_v58, 0.0  ;;  %v1079_v43 = vadd.f32 %v2022_v28, %v1078_v8 }
 0x2d4   :  { %v1380_v44 = vsel %vm1365_vm8, %v1272_v33, %v1379_v40  ;;  %v1284_v45 = vmax.f32 %v1282_v29, %v1283_v37  ;;  %v1277_v46 = vrot.slane %v1276_v38, 1  ;;  %v1094_v50 = vadd.f32 %v1726_v21, %v2022_v28 }
 0x2d5   :  { %1394 = vst [vmem:[%s2103_s7 + $0x10] sm:$0xff] %v1380_v44  ;;  %v1286_v47 = vmax.f32 %v1123_v35, %v1285_v41  ;;  %v1303_v48 = vrot.slane %v1126_v42, 4  ;;  %v1125_v49 = vmax.f32 %v1079_v43, 0.0  ;;  %v1294_v52 = vmax.f32 %v1292_v31, %v1293_v39 }
 0x2d6   :  { %v1278_v51 = vmax.f32 %v1276_v38, %v1277_v46  ;;  %v1089_v53 = vadd.f32 %v2022_v28, %v1088_v27  ;;  %v1128_v57 = vmax.f32 %v1094_v50, 0.0 }
 0x2d7   :  { %v1287_v54 = vrot.slane %v1286_v47, 2  ;;  %v1304_v55 = vmax.f32 %v1126_v42, %v1303_v48  ;;  %v1297_v56 = vrot.slane %v1125_v49, 4  ;;  %v1295_v0 = vrot.slane %v1294_v52, 1 }
 0x2d8   :  { %v1381_v59 = vsel %vm1353_vm2, %v1284_v45, %v1278_v51  ;;  %v1127_v60 = vmax.f32 %v1089_v53, 0.0  ;;  %v1315_v63 = vrot.slane %v1128_v57, 4 }
 0x2d9   :  { %v1288_v24 = vmax.f32 %v1286_v47, %v1287_v54  ;;  %v1305_v61 = vrot.slane %v1304_v55, 2  ;;  %v1298_v62 = vmax.f32 %v1125_v49, %v1297_v56  ;;  %v1296_v9 = vmax.f32 %v1294_v52, %v1295_v0 }
 0x2da   :  { %v1309_v1 = vrot.slane %v1127_v60, 4  ;;  %v1316_v5 = vmax.f32 %v1128_v57, %v1315_v63 }
 0x2db   :  { %v1289_v2 = vrot.slane %v1288_v24, 1  ;;  %v1306_v3 = vmax.f32 %v1304_v55, %v1305_v61  ;;  %v1299_v4 = vrot.slane %v1298_v62, 2 }
 0x2dc   :  { %v1310_v6 = vmax.f32 %v1127_v60, %v1309_v1  ;;  %v1317_v8 = vrot.slane %v1316_v5, 2 }
 0x2dd   :  { %v1290_v7 = vmax.f32 %v1288_v24, %v1289_v2  ;;  %v1300_v28 = vmax.f32 %v1298_v62, %v1299_v4  ;;  %v1307_v10 = vrot.slane %v1306_v3, 1 }
 0x2de   :  { %v1311_v11 = vrot.slane %v1310_v6, 2  ;;  %v1318_v14 = vmax.f32 %v1316_v5, %v1317_v8 }
 0x2df   :  { %v1382_v12 = vsel %vm1355_vm3, %v1290_v7, %v1381_v59  ;;  %v1301_v13 = vrot.slane %v1300_v28, 1  ;;  %v1308_v19 = vmax.f32 %v1306_v3, %v1307_v10 }
 0x2e0   :  { %v1383_v15 = vsel %vm1357_vm4, %v1296_v9, %v1382_v12  ;;  %v1312_v16 = vmax.f32 %v1310_v6, %v1311_v11  ;;  %v1319_v18 = vrot.slane %v1318_v14, 1 }
 0x2e1   :  { %v1302_v17 = vmax.f32 %v1300_v28, %v1301_v13 }
 0x2e2   :  { %v1313_v20 = vrot.slane %v1312_v16, 1  ;;  %v1320_v25 = vmax.f32 %v1318_v14, %v1319_v18 }
 0x2e3   :  { %v1384_v21 = vsel %vm1359_vm5, %v1302_v17, %v1383_v15 }
 0x2e4   :  { %v1314_v22 = vmax.f32 %v1312_v16, %v1313_v20  ;;  %v1385_v23 = vsel %vm1361_vm6, %v1308_v19, %v1384_v21 }
 0x2e6   :  { %v1386_v26 = vsel %vm1363_vm7, %v1314_v22, %v1385_v23 }
 0x2e7   :  { %v1387_v27 = vsel %vm1365_vm8, %v1320_v25, %v1386_v26 }
 0x2e8   :  { %1395 = vst [vmem:[%s2103_s7 + $0x18] sm:$0xff] %v1387_v27 }

// kernel: squeeze.1
= control target key start
LH: loop header
LB: loop body
LE: loop exit
PB: predicated region body
PF: predicated region fallthrough
CT: control target
= control target key end

     0   :  { %vm7_vm0 = vcmask 523264   ;;  %s39_s0 = inlined_call_operand.vmem [shape: f32[128], index: 0, kind: input, shape index: {}]   ;;  %s40_s1 = inlined_call_operand.vmem [shape: f32[2,64], index: 1, kind: output, shape index: {}]  }
   0x1   :  { %v4_v0 = vld [vmem:[%s39_s0] sm:$0x1]  ;;  %s22_s0 = smov 64  }
   0x2   :  { %5 = vst [vmem:[#allocation1] sm:$0x1] %v4_v0 }
   0x9   :  { %v9_v1 = vld [vmem:[#allocation1] sm:$0x1]  }
   0xa   :  { %v6_v2 = vld [vmem:[#allocation1] sm:$0x1]   ;;  %10 = vrot.lane.b32.xlu0 %v9_v1, %s22_s0 }
   0xb   :  { %8 = vst.msk [vmem:[#allocation0] sm:$0x1] %vm7_vm0, %v6_v2  }
  0x7c   :  { %v11_v3 = vpop.permute.xlu0 %10  }
  0x7d   :  { %14 = vst.msk [vmem:[#allocation0 + $0x1] sm:$0x1] %vm7_vm0, %v11_v3  }
  0x84   :  { %v18_v4 = vld [vmem:[#allocation0] sm:$0x3] }
  0x85   :  { %20 = vst [vmem:[%s40_s1] sm:$0x3] %v18_v4 }

// kernel: forward.3
= control target key start
LH: loop header
LB: loop body
LE: loop exit
PB: predicated region body
PF: predicated region fallthrough
CT: control target
= control target key end

     0   :  { %vm139_vm0 = vcmask 785408   ;;  %s1355_s0 = inlined_call_operand.vmem [shape: bf16[128,96], index: 0, kind: input, shape index: {}]   ;;  %s1356_s1 = inlined_call_operand.vmem [shape: bf16[96,32], index: 1, kind: input, shape index: {}]   ;;  %s1357_s2 = inlined_call_operand.vmem [shape: f32[1,32], index: 2, kind: input, shape index: {}]   ;;  %s1358_s3 = inlined_call_operand.vmem [shape: f32[32,32], index: 3, kind: input, shape index: {}]   ;;  %s1359_s4 = inlined_call_operand.vmem [shape: f32[1,32], index: 4, kind: input, shape index: {}]   ;;  %s1360_s5 = inlined_call_operand.vmem [shape: f32[32,128], index: 5, kind: input, shape index: {}]   ;;  %s1361_s6 = inlined_call_operand.vmem [shape: f32[1,128], index: 6, kind: input, shape index: {}]   ;;  %s1362_s7 = inlined_call_operand.hbm [shape: f32[16,128], index: 7, kind: output, shape index: {}]  }
   0x1   :  { %v1097_v0 = vld [vmem:[%s1356_s1] sm:$0xff]   ;;  %v1098_v1 = vld [vmem:[%s1356_s1 + $0x8] sm:$0xff]   ;;  %v1099_v2 = vld [vmem:[%s1356_s1 + $0x10] sm:$0xff]  }
   0x2   :  { %982 = vmatprep.subr.bf16.mxu0 %v1097_v0  ;;  %v1103_v3 = vld [vmem:[%s1355_s0] sm:$0xff]   ;;  %v1100_v4 = vld [vmem:[%s1356_s1 + $0x18] sm:$0xff]   ;;  %v278_v7 = vld [vmem:[%s1358_s3 + $0x8] sm:$0xff] }
   0x3   :  { %983 = vmatpush3.bf16.msra.mxu0 %v1097_v0  ;;  %994 = vmatprep.mubr.msk.bf16.mxu0 %vm139_vm0, %v1103_v3  ;;  %v1101_v5 = vld [vmem:[%s1356_s1 + $0x20] sm:$0xff]   ;;  %v279_v8 = vld [vmem:[%s1358_s3 + $0x10] sm:$0xff]  ;;  %v280_v10 = vld [vmem:[%s1358_s3 + $0x18] sm:$0xff] }
   0x4   :  { %984 = vmatprep.subr.bf16.mxu0 %v1098_v1  ;;  %v277_v6 = vld [vmem:[%s1358_s3] sm:$0xff] }
   0x5   :  { %v1074_v9 = vpack.c.bf16 %v278_v7, %v277_v6 }
   0x7   :  { %985 = vmatpush3.bf16.msra.mxu0 %v1098_v1 }
   0x8   :  { %986 = vmatprep.subr.bf16.mxu0 %v1099_v2 }
   0xb   :  { %987 = vmatpush3.bf16.msra.mxu0 %v1099_v2 }
   0xc   :  { %988 = vmatprep.subr.bf16.mxu0 %v1100_v4 }
   0xf   :  { %989 = vmatpush3.bf16.msra.mxu0 %v1100_v4 }
  0x10   :  { %12 = vsyncpa [#allocation3], 0  ;;  %990 = vmatprep.subr.bf16.mxu0 %v1101_v5  ;;  %v1102_v11 = vld [vmem:[%s1356_s1 + $0x28] sm:$0xff]   ;;  %v1078_v12 = vpack.c.bf16 %v280_v10, %v279_v8  ;;  %1090 = vmatprep.subr.bf16.mxu1 %v1074_v9  ;;  %v1105_v14 = vld [vmem:[%s1355_s0 + $0x10] sm:$0xff]   ;;  %vm288_vm1 = vcmask 261120   ;;  %vm830_vm2 = vcmask 1041409  }
  0x11   :  { %1092 = vmatpush3.bf16.msra.mxu1 %v1074_v9  ;;  %v1104_v13 = vld [vmem:[%s1355_s0 + $0x8] sm:$0xff]   ;;  %v1106_v15 = vld [vmem:[%s1355_s0 + $0x18] sm:$0xff]   ;;  %v1107_v16 = vld [vmem:[%s1355_s0 + $0x20] sm:$0xff]   ;;  %vm832_vm3 = vcmask 1042434   ;;  %vm834_vm4 = vcmask 1043459   ;;  %vm836_vm5 = vcmask 1044484  }
  0x12   :  { %1091 = vmatprep.subr.bf16.mxu1 %v1078_v12  ;;  %v1108_v17 = vld [vmem:[%s1355_s0 + $0x28] sm:$0xff]   ;;  %v1109_v18 = vld [vmem:[%s1355_s0 + $0x30] sm:$0xff]   ;;  %v1110_v19 = vld [vmem:[%s1355_s0 + $0x38] sm:$0xff]   ;;  %vm838_vm6 = vcmask 1045509   ;;  %vm840_vm7 = vcmask 1046534   ;;  %vm842_vm8 = vcmask 1047559  }
  0x13   :  { %991 = vmatpush3.bf16.msra.mxu0 %v1101_v5  ;;  %v498_v20 = vld [vmem:[%s1360_s5] sm:$0xff]  ;;  %v499_v21 = vld [vmem:[%s1360_s5 + $0x8] sm:$0xff]  ;;  %v500_v42 = vld [vmem:[%s1360_s5 + $0x10] sm:$0xff] }
  0x14   :  { %992 = vmatprep.subr.bf16.mxu0 %v1102_v11  ;;  %v1082_v22 = vpack.c.bf16 %v499_v21, %v498_v20  ;;  %v1249_v23 = vld [vmem:[%s1357_s2] ss:$0 sm:$0xff]  ;;  %v501_v43 = vld [vmem:[%s1360_s5 + $0x18] sm:$0xff] }
  0x15   :  { %1093 = vmatpush3.bf16.msra.mxu1 %v1078_v12  ;;  %v1086_v48 = vpack.c.bf16 %v501_v43, %v500_v42 }
  0x16   :  { %1083 = vmatprep.subr.bf16.mxu1 %v1082_v22 }
  0x17   :  { %993 = vmatpush3.bf16.msra.mxu0 %v1102_v11  ;;  %v894_v11 = vld [vmem:[%s1359_s4] ss:$0 sm:$0xff] }
  0x18   :  { %1075 = vmatprep.subr.bf16.mxu0 %v1074_v9 }
  0x1a   :  { %995 = vmatmul.mubr.msk.bf16.vlgmr.msra.gmra.mrb[0].mxu0 %vm139_vm0, %v1104_v13 }
  0x1b   :  { %998 = vmatprep.mubr.msk.bf16.mxu0 %vm139_vm0, %v1105_v14  ;;  %1077 = vmatpush3.bf16.msra.mxu0 %v1074_v9 }
  0x1c   :  { %1079 = vmatprep.subr.bf16.mxu0 %v1078_v12 }
  0x1f   :  { %1081 = vmatpush3.bf16.msra.mxu0 %v1078_v12 }
  0x22   :  { %999 = vmatmul.mubr.msk.bf16.gmra.mrb[4].mxu0 %vm139_vm0, %v1106_v15 }
  0x23   :  { %1002 = vmatprep.mubr.msk.bf16.mxu0 %vm139_vm0, %v1107_v16 }
  0x2a   :  { %1003 = vmatmul.mubr.msk.bf16.gmra.mrb[8].mxu0 %vm139_vm0, %v1108_v17 }
  0x2b   :  { %1006 = vmatprep.mubr.msk.bf16.mxu0 %vm139_vm0, %v1109_v18 }
  0x32   :  { %1007 = vmatmul.mubr.msk.bf16.gmra.mrb[12].mxu0 %vm139_vm0, %v1110_v19 }
  0xed   :  { %v996_v24 = vpop.f32.mrb[0].mxu0 }
  0xee   :  { %v198_v25 = vpop.f32.mrb[1].mxu0  ;;  %v207_v28 = vadd.f32 %v996_v24, %v1249_v23 }
  0xef   :  { %v199_v26 = vadd.f32 %v1249_v23, %v198_v25  ;;  %v997_v27 = vpop.f32.mrb[2].mxu0 }
  0xf0   :  { %v201_v29 = vpop.f32.mrb[3].mxu0  ;;  %v210_v32 = vadd.f32 %v997_v27, %v1249_v23  ;;  %v263_v34 = vmax.f32 %v207_v28, 0.0 }
  0xf1   :  { %v261_v30 = vmax.f32 %v199_v26, 0.0  ;;  %v202_v31 = vadd.f32 %v1249_v23, %v201_v29 }
  0xf2   :  { %v264_v37 = vmax.f32 %v210_v32, 0.0 }
  0xf3   :  { %v262_v33 = vmax.f32 %v202_v31, 0.0  ;;  %1018 = vmatprep.mubr.msk.f32.mxu0 %vm288_vm1, %v261_v30 }
  0xf5   :  { %v1000_v35 = vpop.f32.mrb[4].mxu0  ;;  %1019 = vmatmul.mubr.msk.f32.vlgmr.msra.gmra.mrb[16].mxu0 %vm288_vm1, %v262_v33 }
  0xf6   :  { %v214_v36 = vpop.f32.mrb[5].mxu0  ;;  %1021 = vmatprep.mubr.msk.f32.mxu0 %vm288_vm1, %v263_v34  ;;  %v223_v40 = vadd.f32 %v1000_v35, %v1249_v23 }
  0xf7   :  { %v215_v38 = vadd.f32 %v1249_v23, %v214_v36  ;;  %v1001_v39 = vpop.f32.mrb[6].mxu0 }
  0xf8   :  { %v217_v41 = vpop.f32.mrb[7].mxu0  ;;  %v226_v46 = vadd.f32 %v1001_v39, %v1249_v23  ;;  %v267_v49 = vmax.f32 %v223_v40, 0.0 }
  0xf9   :  { %v265_v44 = vmax.f32 %v215_v38, 0.0  ;;  %v218_v45 = vadd.f32 %v1249_v23, %v217_v41  ;;  %1022 = vmatmul.mubr.msk.f32.gmra.mrb[18].mxu0 %vm288_vm1, %v264_v37 }
  0xfa   :  { %v268_v52 = vmax.f32 %v226_v46, 0.0 }
  0xfb   :  { %v266_v47 = vmax.f32 %v218_v45, 0.0  ;;  %1024 = vmatprep.mubr.msk.f32.mxu1 %vm288_vm1, %v265_v44 }
  0xfd   :  { %v1004_v50 = vpop.f32.mrb[8].mxu0  ;;  %1025 = vmatmul.mubr.msk.f32.vlgmr.msra.gmra.mrb[0].mxu1 %vm288_vm1, %v266_v47 }
  0xfe   :  { %v230_v51 = vpop.f32.mrb[9].mxu0  ;;  %1027 = vmatprep.mubr.msk.f32.mxu1 %vm288_vm1, %v267_v49  ;;  %1085 = vmatpush3.bf16.msra.mxu1 %v1082_v22  ;;  %v239_v55 = vadd.f32 %v1004_v50, %v1249_v23 }
  0xff   :  { %v231_v53 = vadd.f32 %v1249_v23, %v230_v51  ;;  %v1005_v54 = vpop.f32.mrb[10].mxu0  ;;  %1087 = vmatprep.subr.bf16.mxu1 %v1086_v48 }
 0x100   :  { %v233_v56 = vpop.f32.mrb[11].mxu0  ;;  %v242_v59 = vadd.f32 %v1005_v54, %v1249_v23  ;;  %v271_v61 = vmax.f32 %v239_v55, 0.0 }
 0x101   :  { %v269_v57 = vmax.f32 %v231_v53, 0.0  ;;  %v234_v58 = vadd.f32 %v1249_v23, %v233_v56  ;;  %1028 = vmatmul.mubr.msk.f32.gmra.mrb[2].mxu1 %vm288_vm1, %v268_v52 }
 0x102   :  { %1089 = vmatpush3.bf16.msra.mxu1 %v1086_v48  ;;  %v272_v0 = vmax.f32 %v242_v59, 0.0 }
 0x103   :  { %v270_v60 = vmax.f32 %v234_v58, 0.0  ;;  %1030 = vmatprep.mubr.msk.f32.mxu1 %vm288_vm1, %v269_v57 }
 0x105   :  { %v1008_v62 = vpop.f32.mrb[12].mxu0  ;;  %1031 = vmatmul.mubr.msk.f32.gmra.mrb[4].mxu1 %vm288_vm1, %v270_v60  ;;  %v1311_v60 = vld [vmem:[%s1361_s6] ss:$0 sm:$0xff]  ;;  %s1135_s6 = smov [#allocation2]  }
 0x106   :  { %v246_v63 = vpop.f32.mrb[13].mxu0  ;;  %1033 = vmatprep.mubr.msk.f32.mxu1 %vm288_vm1, %v271_v61  ;;  %v255_v3 = vadd.f32 %v1008_v62, %v1249_v23  ;;  %s860_s22 = sshll.u32 %s1135_s6, 4  ;;  %s861_s22 = int_to_ptr.vmem [resolvable:$true] %s860_s22 }
 0x107   :  { %v247_v1 = vadd.f32 %v1249_v23, %v246_v63  ;;  %v1009_v2 = vpop.f32.mrb[14].mxu0  ;;  %s1111_s23 = scalar_lea.vmem %s861_s22, 256  ;;  %p1116_p1 = scmp.lt.s32.totalorder %s861_s22, %s861_s22 }
 0x108   :  { %v249_v4 = vpop.f32.mrb[15].mxu0  ;;  %v258_v7 = vadd.f32 %v1009_v2, %v1249_v23  ;;  %v275_v9 = vmax.f32 %v255_v3, 0.0  ;;  %p1112_p0 = scmp.ne.s32.totalorder %s861_s22, %s1111_s23  ;;  %p1117_p2 = scmp.lt.s32.totalorder %s1111_s23, %s1111_s23 }
 0x109   :  { %v273_v5 = vmax.f32 %v247_v1, 0.0  ;;  %v250_v6 = vadd.f32 %v1249_v23, %v249_v4  ;;  %1034 = vmatmul.mubr.msk.f32.gmra.mrb[6].mxu1 %vm288_vm1, %v272_v0 }
 0x10a   :  { %v276_v10 = vmax.f32 %v258_v7, 0.0  ;;  %p1118_p3 = por %p1117_p2, %p1116_p1 }
 0x10b   :  { %v274_v8 = vmax.f32 %v250_v6, 0.0  ;;  %1036 = vmatprep.mubr.msk.f32.mxu1 %vm288_vm1, %v273_v5 }
 0x10c   :  { %p1119_p4 = pnand %p1118_p3, %p1112_p0 }
 0x10d   :  { %1037 = vmatmul.mubr.msk.f32.gmra.mrb[8].mxu1 %vm288_vm1, %v274_v8 }
 0x10e   :  { %1039 = vmatprep.mubr.msk.f32.mxu1 %vm288_vm1, %v275_v9 }
 0x111   :  { %1040 = vmatmul.mubr.msk.f32.gmra.mrb[10].mxu1 %vm288_vm1, %v276_v10 }
 0x1c8   :  { %v1020_v12 = vpop.f32.mrb[16].mxu0 }
 0x1c9   :  { %v409_v13 = vadd.f32 %v1020_v12, %v894_v11  ;;  %v403_v14 = vpop.f32.mrb[17].mxu0 }
 0x1ca   :  { %v404_v15 = vadd.f32 %v894_v11, %v403_v14 }
 0x1cb   :  { %v483_v18 = vmax.f32 %v409_v13, 0.0 }
 0x1cc   :  { %v482_v16 = vmax.f32 %v404_v15, 0.0  ;;  %v1023_v17 = vpop.f32.mrb[18].mxu0 }
 0x1cd   :  { %v419_v19 = vadd.f32 %v1023_v17, %v894_v11  ;;  %v413_v20 = vpop.f32.mrb[19].mxu0 }
 0x1ce   :  { %v414_v21 = vadd.f32 %v894_v11, %v413_v20  ;;  %1050 = vmatprep.mubr.msk.f32.mxu1 %vm288_vm1, %v482_v16 }
 0x1cf   :  { %1051 = vmatmul.mubr.msk.f32.vlgmr.msra.gmra.mrb[12].mxu1 %vm288_vm1, %v483_v18  ;;  %v485_v24 = vmax.f32 %v419_v19, 0.0 }
 0x1d0   :  { %v484_v22 = vmax.f32 %v414_v21, 0.0  ;;  %v1026_v23 = vpop.f32.mrb[0].mxu1 }
 0x1d1   :  { %v429_v25 = vadd.f32 %v1026_v23, %v894_v11  ;;  %v423_v26 = vpop.f32.mrb[1].mxu1 }
 0x1d2   :  { %v424_v27 = vadd.f32 %v894_v11, %v423_v26  ;;  %1053 = vmatprep.mubr.msk.f32.mxu1 %vm288_vm1, %v484_v22 }
 0x1d3   :  { %1054 = vmatmul.mubr.msk.f32.gmra.mrb[14].mxu1 %vm288_vm1, %v485_v24  ;;  %v487_v30 = vmax.f32 %v429_v25, 0.0 }
 0x1d4   :  { %v486_v28 = vmax.f32 %v424_v27, 0.0  ;;  %v1029_v29 = vpop.f32.mrb[2].mxu1 }
 0x1d5   :  { %v439_v31 = vadd.f32 %v1029_v29, %v894_v11  ;;  %v433_v32 = vpop.f32.mrb[3].mxu1 }
 0x1d6   :  { %v434_v33 = vadd.f32 %v894_v11, %v433_v32  ;;  %1056 = vmatprep.mubr.msk.f32.mxu1 %vm288_vm1, %v486_v28 }
 0x1d7   :  { %1057 = vmatmul.mubr.msk.f32.gmra.mrb[16].mxu1 %vm288_vm1, %v487_v30  ;;  %v489_v36 = vmax.f32 %v439_v31, 0.0 }
 0x1d8   :  { %v488_v34 = vmax.f32 %v434_v33, 0.0  ;;  %v1032_v35 = vpop.f32.mrb[4].mxu1 }
 0x1d9   :  { %v449_v37 = vadd.f32 %v1032_v35, %v894_v11  ;;  %v443_v38 = vpop.f32.mrb[5].mxu1 }
 0x1da   :  { %v444_v39 = vadd.f32 %v894_v11, %v443_v38  ;;  %1059 = vmatprep.mubr.msk.f32.mxu1 %vm288_vm1, %v488_v34 }
 0x1db   :  { %1060 = vmatmul.mubr.msk.f32.gmra.mrb[18].mxu1 %vm288_vm1, %v489_v36  ;;  %v491_v42 = vmax.f32 %v449_v37, 0.0 }
 0x1dc   :  { %v490_v40 = vmax.f32 %v444_v39, 0.0  ;;  %v1035_v41 = vpop.f32.mrb[6].mxu1 }
 0x1dd   :  { %v459_v43 = vadd.f32 %v1035_v41, %v894_v11  ;;  %v453_v44 = vpop.f32.mrb[7].mxu1 }
 0x1de   :  { %v454_v45 = vadd.f32 %v894_v11, %v453_v44  ;;  %1062 = vmatprep.mubr.msk.f32.mxu1 %vm288_vm1, %v490_v40 }
 0x1df   :  { %1063 = vmatmul.mubr.msk.f32.gmra.mrb[20].mxu1 %vm288_vm1, %v491_v42  ;;  %v493_v48 = vmax.f32 %v459_v43, 0.0 }
 0x1e0   :  { %v492_v46 = vmax.f32 %v454_v45, 0.0  ;;  %v1038_v47 = vpop.f32.mrb[8].mxu1 }
 0x1e1   :  { %v469_v49 = vadd.f32 %v1038_v47, %v894_v11  ;;  %v463_v50 = vpop.f32.mrb[9].mxu1 }
 0x1e2   :  { %v464_v51 = vadd.f32 %v894_v11, %v463_v50  ;;  %1065 = vmatprep.mubr.msk.f32.mxu1 %vm288_vm1, %v492_v46 }
 0x1e3   :  { %1066 = vmatmul.mubr.msk.f32.gmra.mrb[22].mxu1 %vm288_vm1, %v493_v48  ;;  %v495_v54 = vmax.f32 %v469_v49, 0.0 }
 0x1e4   :  { %v494_v52 = vmax.f32 %v464_v51, 0.0  ;;  %v1041_v53 = vpop.f32.mrb[10].mxu1 }
 0x1e5   :  { %v479_v55 = vadd.f32 %v1041_v53, %v894_v11  ;;  %v473_v56 = vpop.f32.mrb[11].mxu1 }
 0x1e6   :  { %v474_v57 = vadd.f32 %v894_v11, %v473_v56  ;;  %1068 = vmatprep.mubr.msk.f32.mxu1 %vm288_vm1, %v494_v52 }
 0x1e7   :  { %1069 = vmatmul.mubr.msk.f32.gmra.mrb[24].mxu1 %vm288_vm1, %v495_v54  ;;  %v497_v59 = vmax.f32 %v479_v55, 0.0 }
 0x1e8   :  { %v496_v58 = vmax.f32 %v474_v57, 0.0 }
 0x1ea   :  { %1071 = vmatprep.mubr.msk.f32.mxu1 %vm288_vm1, %v496_v58 }
 0x1eb   :  { %1072 = vmatmul.mubr.msk.f32.gmra.mrb[26].mxu1 %vm288_vm1, %v497_v59 }
 0x2a2   :  { %v1052_v61 = vpop.f32.mrb[12].mxu1 }
 0x2a3   :  { %v629_v62 = vadd.f32 %v1052_v61, %v1311_v60  ;;  %v623_v63 = vpop.f32.mrb[13].mxu1 }
 0x2a4   :  { %v624_v0 = vadd.f32 %v1311_v60, %v623_v63 }
 0x2a5   :  { %v703_v1 = vmax.f32 %v629_v62, 0.0 }
 0x2a6   :  { %v702_v2 = vmax.f32 %v624_v0, 0.0  ;;  %v1055_v3 = vpop.f32.mrb[14].mxu1 }
 0x2a7   :  { %v724_v4 = vrot.slane %v703_v1, 4  ;;  %v639_v5 = vadd.f32 %v1055_v3, %v1311_v60  ;;  %v633_v6 = vpop.f32.mrb[15].mxu1 }
 0x2a8   :  { %v718_v7 = vrot.slane %v702_v2, 4  ;;  %v634_v8 = vadd.f32 %v1311_v60, %v633_v6 }
 0x2a9   :  { %v725_v9 = vmax.f32 %v703_v1, %v724_v4  ;;  %v705_v10 = vmax.f32 %v639_v5, 0.0 }
 0x2aa   :  { %v719_v11 = vmax.f32 %v702_v2, %v718_v7  ;;  %v704_v12 = vmax.f32 %v634_v8, 0.0  ;;  %v1058_v13 = vpop.f32.mrb[16].mxu1 }
 0x2ab   :  { %v726_v14 = vrot.slane %v725_v9, 2  ;;  %v736_v15 = vrot.slane %v705_v10, 4  ;;  %v649_v16 = vadd.f32 %v1058_v13, %v1311_v60  ;;  %v643_v17 = vpop.f32.mrb[17].mxu1 }
 0x2ac   :  { %v720_v18 = vrot.slane %v719_v11, 2  ;;  %v730_v19 = vrot.slane %v704_v12, 4  ;;  %v644_v20 = vadd.f32 %v1311_v60, %v643_v17 }
 0x2ad   :  { %v727_v21 = vmax.f32 %v725_v9, %v726_v14  ;;  %v737_v22 = vmax.f32 %v705_v10, %v736_v15  ;;  %v707_v23 = vmax.f32 %v649_v16, 0.0 }
 0x2ae   :  { %v721_v24 = vmax.f32 %v719_v11, %v720_v18  ;;  %v731_v25 = vmax.f32 %v704_v12, %v730_v19  ;;  %v706_v26 = vmax.f32 %v644_v20, 0.0  ;;  %v1061_v27 = vpop.f32.mrb[18].mxu1 }
 0x2af   :  { %v728_v28 = vrot.slane %v727_v21, 1  ;;  %v738_v29 = vrot.slane %v737_v22, 2  ;;  %v748_v30 = vrot.slane %v707_v23, 4  ;;  %v659_v31 = vadd.f32 %v1061_v27, %v1311_v60  ;;  %v653_v32 = vpop.f32.mrb[19].mxu1 }
 0x2b0   :  { %v722_v33 = vrot.slane %v721_v24, 1  ;;  %v732_v34 = vrot.slane %v731_v25, 2  ;;  %v742_v35 = vrot.slane %v706_v26, 4  ;;  %v654_v36 = vadd.f32 %v1311_v60, %v653_v32 }
 0x2b1   :  { %v729_v37 = vmax.f32 %v727_v21, %v728_v28  ;;  %v739_v38 = vmax.f32 %v737_v22, %v738_v29  ;;  %v749_v39 = vmax.f32 %v707_v23, %v748_v30  ;;  %v709_v40 = vmax.f32 %v659_v31, 0.0 }
 0x2b2   :  { %v723_v41 = vmax.f32 %v721_v24, %v722_v33  ;;  %v733_v42 = vmax.f32 %v731_v25, %v732_v34  ;;  %v743_v43 = vmax.f32 %v706_v26, %v742_v35  ;;  %v708_v44 = vmax.f32 %v654_v36, 0.0  ;;  %v1064_v45 = vpop.f32.mrb[20].mxu1 }
 0x2b3   :  { %v740_v46 = vrot.slane %v739_v38, 1  ;;  %v750_v47 = vrot.slane %v749_v39, 2  ;;  %v760_v48 = vrot.slane %v709_v40, 4  ;;  %v669_v49 = vadd.f32 %v1064_v45, %v1311_v60  ;;  %v663_v50 = vpop.f32.mrb[21].mxu1 }
 0x2b4   :  { %v831_v51 = vsel %vm830_vm2, %v729_v37, %v723_v41  ;;  %v734_v52 = vrot.slane %v733_v42, 1  ;;  %v744_v53 = vrot.slane %v743_v43, 2  ;;  %v754_v54 = vrot.slane %v708_v44, 4 }
 0x2b5   :  { %v741_v55 = vmax.f32 %v739_v38, %v740_v46  ;;  %v751_v56 = vmax.f32 %v749_v39, %v750_v47  ;;  %v761_v57 = vmax.f32 %v709_v40, %v760_v48  ;;  %v711_v58 = vmax.f32 %v669_v49, 0.0 }
 0x2b6   :  { %v735_v59 = vmax.f32 %v733_v42, %v734_v52  ;;  %v745_v61 = vmax.f32 %v743_v43, %v744_v53  ;;  %v755_v62 = vmax.f32 %v708_v44, %v754_v54  ;;  %v664_v63 = vadd.f32 %v1311_v60, %v663_v50  ;;  %v1067_v0 = vpop.f32.mrb[22].mxu1 }
 0x2b7   :  { %v752_v1 = vrot.slane %v751_v56, 1  ;;  %v762_v2 = vrot.slane %v761_v57, 2  ;;  %v772_v3 = vrot.slane %v711_v58, 4  ;;  %v679_v4 = vadd.f32 %v1067_v0, %v1311_v60  ;;  %v673_v5 = vpop.f32.mrb[23].mxu1 }
 0x2b8   :  { %v833_v6 = vsel %vm832_vm3, %v735_v59, %v831_v51  ;;  %v746_v7 = vrot.slane %v745_v61, 1  ;;  %v756_v8 = vrot.slane %v755_v62, 2  ;;  %v710_v9 = vmax.f32 %v664_v63, 0.0 }
 0x2b9   :  { %v835_v10 = vsel %vm834_vm4, %v741_v55, %v833_v6  ;;  %v763_v11 = vmax.f32 %v761_v57, %v762_v2  ;;  %v773_v12 = vmax.f32 %v711_v58, %v772_v3  ;;  %v713_v16 = vmax.f32 %v679_v4, 0.0 }
 0x2ba   :  { %v747_v13 = vmax.f32 %v745_v61, %v746_v7  ;;  %v757_v14 = vmax.f32 %v755_v62, %v756_v8  ;;  %v766_v15 = vrot.slane %v710_v9, 4  ;;  %v1070_v17 = vpop.f32.mrb[24].mxu1  ;;  %v753_v18 = vmax.f32 %v751_v56, %v752_v1 }
 0x2bb   :  { %v774_v19 = vrot.slane %v773_v12, 2  ;;  %v674_v20 = vadd.f32 %v1311_v60, %v673_v5  ;;  %v689_v21 = vadd.f32 %v1070_v17, %v1311_v60  ;;  %v683_v22 = vpop.f32.mrb[25].mxu1  ;;  %v784_v26 = vrot.slane %v713_v16, 4 }
 0x2bc   :  { %v837_v23 = vsel %vm836_vm5, %v747_v13, %v835_v10  ;;  %v758_v24 = vrot.slane %v757_v14, 1  ;;  %v767_v25 = vmax.f32 %v710_v9, %v766_v15  ;;  %v764_v27 = vrot.slane %v763_v11, 1 }
 0x2bd   :  { %v775_v28 = vmax.f32 %v773_v12, %v774_v19  ;;  %v712_v29 = vmax.f32 %v674_v20, 0.0  ;;  %v715_v30 = vmax.f32 %v689_v21, 0.0  ;;  %v785_v33 = vmax.f32 %v713_v16, %v784_v26 }
 0x2be   :  { %v759_v31 = vmax.f32 %v757_v14, %v758_v24  ;;  %v768_v32 = vrot.slane %v767_v25, 2  ;;  %v684_v34 = vadd.f32 %v1311_v60, %v683_v22  ;;  %v1073_v35 = vpop.f32.mrb[26].mxu1  ;;  %v839_v56 = vsel %vm838_vm6, %v753_v18, %v837_v23 }
 0x2bf   :  { %v776_v36 = vrot.slane %v775_v28, 1  ;;  %v778_v37 = vrot.slane %v712_v29, 4  ;;  %v796_v38 = vrot.slane %v715_v30, 4  ;;  %v699_v39 = vadd.f32 %v1073_v35, %v1311_v60  ;;  %v693_v40 = vpop.f32.mrb[27].mxu1 }
 0x2c0   :  { %v769_v41 = vmax.f32 %v767_v25, %v768_v32  ;;  %v786_v42 = vrot.slane %v785_v33, 2  ;;  %v714_v43 = vmax.f32 %v684_v34, 0.0  ;;  %v694_v44 = vadd.f32 %v1311_v60, %v693_v40 }
 0x2c1   :  { %v777_v45 = vmax.f32 %v775_v28, %v776_v36  ;;  %v779_v46 = vmax.f32 %v712_v29, %v778_v37  ;;  %v797_v47 = vmax.f32 %v715_v30, %v796_v38  ;;  %v717_v48 = vmax.f32 %v699_v39, 0.0 }
 0x2c2   :  { %v770_v49 = vrot.slane %v769_v41, 1  ;;  %v787_v50 = vmax.f32 %v785_v33, %v786_v42  ;;  %v790_v51 = vrot.slane %v714_v43, 4  ;;  %v716_v52 = vmax.f32 %v694_v44, 0.0 }
 0x2c3   :  { %v780_v53 = vrot.slane %v779_v46, 2  ;;  %v798_v54 = vrot.slane %v797_v47, 2  ;;  %v808_v55 = vrot.slane %v717_v48, 4  ;;  %v765_v57 = vmax.f32 %v763_v11, %v764_v27 }
 0x2c4   :  { %v771_v58 = vmax.f32 %v769_v41, %v770_v49  ;;  %v791_v59 = vmax.f32 %v714_v43, %v790_v51  ;;  %v802_v61 = vrot.slane %v716_v52, 4  ;;  %v841_v0 = vsel %vm840_vm7, %v759_v31, %v839_v56 }
 0x2c5   :  { %v781_v62 = vmax.f32 %v779_v46, %v780_v53  ;;  %v799_v63 = vmax.f32 %v797_v47, %v798_v54  ;;  %v809_v60 = vmax.f32 %v717_v48, %v808_v55  ;;  %v788_v2 = vrot.slane %v787_v50, 1 }
 0x2c6   :  { %v844_v1 = vsel %vm830_vm2, %v777_v45, %v771_v58  ;;  %v792_v3 = vrot.slane %v791_v59, 2  ;;  %v803_v4 = vmax.f32 %v716_v52, %v802_v61  ;;  %v843_v7 = vsel %vm842_vm8, %v765_v57, %v841_v0 }
 0x2c7   :  { %v782_v5 = vrot.slane %v781_v62, 1  ;;  %v810_v6 = vrot.slane %v809_v60, 2  ;;  %853 = vst [vmem:[#allocation2] sm:$0xff] %v843_v7  ;;  %v800_v11 = vrot.slane %v799_v63, 1  ;;  %v789_v13 = vmax.f32 %v787_v50, %v788_v2 }
 0x2c8   :  { %v793_v8 = vmax.f32 %v791_v59, %v792_v3  ;;  %v804_v9 = vrot.slane %v803_v4, 2 }
 0x2c9   :  { %v783_v10 = vmax.f32 %v781_v62, %v782_v5  ;;  %v811_v12 = vmax.f32 %v809_v60, %v810_v6  ;;  %v801_v21 = vmax.f32 %v799_v63, %v800_v11 }
 0x2ca   :  { %v794_v14 = vrot.slane %v793_v8, 1  ;;  %v805_v15 = vmax.f32 %v803_v4, %v804_v9 }
 0x2cb   :  { %v845_v16 = vsel %vm832_vm3, %v783_v10, %v844_v1  ;;  %v812_v17 = vrot.slane %v811_v12, 1 }
 0x2cc   :  { %v795_v18 = vmax.f32 %v793_v8, %v794_v14  ;;  %v846_v19 = vsel %vm834_vm4, %v789_v13, %v845_v16  ;;  %v806_v20 = vrot.slane %v805_v15, 1 }
 0x2cd   :  { %v813_v24 = vmax.f32 %v811_v12, %v812_v17 }
 0x2ce   :  { %v847_v22 = vsel %vm836_vm5, %v795_v18, %v846_v19  ;;  %v807_v23 = vmax.f32 %v805_v15, %v806_v20 }
 0x2cf   :  { %v848_v25 = vsel %vm838_vm6, %v801_v21, %v847_v22 }
 0x2d0   :  { %v849_v26 = vsel %vm840_vm7, %v807_v23, %v848_v25 }
 0x2d1   :  { %v850_v27 = vsel %vm842_vm8, %v813_v24, %v849_v26 }
 0x2d2   :  { %854 = vst [vmem:[#allocation2 + $0x8] sm:$0xff] %v850_v27 }
 0x2d3   :  { %1122 = shalt.err (!%p1119_p4)
}
 0x2d4   :  { %s1123_s3 = scalar_lea.hbm %s1362_s7, 256 }
 0x2d5   :  { %p1124_p5 = scmp.ne.s32.totalorder %s1362_s7, %s1123_s3  ;;  %p1127_p6 = scmp.lt.u32.totalorder %s1123_s3, %s1362_s7 }
 0x2d7   :  { %p1129_p7 = pnand %p1127_p6, %p1124_p5 }
 0x2d9   :  { %1132 = shalt.err (!%p1129_p7)
}
 0x2da   :  { %s1136_s29 = smov 128   ;;  %s1137_s30 = smov 8  }
 0x2db   :  { %866 = dma.vmem_to_hbm [thread:$0]  %s861_s22, 256, %s1362_s7, [#allocation3], %s1136_s29, %s1136_s29, %s1137_s30  }
 0x2dc   :  { %1133 = dma.done.wait [#allocation3], 256  }
 0x2dd   :  { %1134 = vsyncadd [#allocation3], 4294967040 }
 0x2de   :  { %870 = vsyncpa [#allocation3], 1 }

</bundles_post_ra>
